<compile_context>
chip_gen: v5e
topology: v5e:2x2
jax: 0.10.0
libtpu: 0.0.40
codegen_flags: <defaults>
</compile_context>

<pallas_src>
import jax
import jax.numpy as jnp
from jax.experimental import pallas as pl
from jax.experimental.pallas import tpu as pltpu


_TARGET_ROWS = 256  # aim ~256 effective matmul rows (v6e/v7x MXU); 128 is fine on v5e


# ----------------------------------------------------------------------------
# Fused per-batch-block kernel:
#   projections + feature map + per-batch KV/context + output projection
# ----------------------------------------------------------------------------
def _make_fused_kernel(block_batch: int, seq_len: int, compute_dtype):
    Bb, L = block_batch, seq_len
    R = Bb * L  # rows per grid step (keep a multiple of 8 for aligned splits)

    def kernel(xq_ref, xk_ref, xv_ref,
               wq_ref, bq_ref, wk_ref, bk_ref, wv_ref, bv_ref,
               w1_ref, b1_ref, w2_ref, b2_ref, mask_ref,
               wo_ref, bo_ref, o_ref):
        cd = compute_dtype
        E = xq_ref.shape[-1]

        # --- q/k/v projections on all Bb*L rows at once (fills MXU rows,
        # amortizes per-grid-step overhead; weights stay VMEM-resident).
        xq = xq_ref[...].reshape(R, E).astype(cd)
        xk = xk_ref[...].reshape(R, E).astype(cd)
        xv = xv_ref[...].reshape(R, E).astype(cd)

        q = jnp.dot(xq, wq_ref[...].astype(cd),
                    preferred_element_type=jnp.float32) + bq_ref[...]
        k = jnp.dot(xk, wk_ref[...].astype(cd),
                    preferred_element_type=jnp.float32) + bk_ref[...]
        v = jnp.dot(xv, wv_ref[...].astype(cd),
                    preferred_element_type=jnp.float32) + bv_ref[...]

        # --- learnable feature map on the stacked [Q; K] rows (2*Bb*L rows)
        # with block-diagonal per-head weights: mathematically identical to
        # applying kernel_net per head, but one MXU call per layer.
        qk = jnp.concatenate([q, k], axis=0).astype(cd)                    # (2R, E)
        h1 = jnp.dot(qk, w1_ref[...].astype(cd),
                     preferred_element_type=jnp.float32) + b1_ref[...]
        h1 = jnp.maximum(h1, 0.0)                                          # ReLU
        z = jnp.dot(h1.astype(cd), w2_ref[...].astype(cd),
                    preferred_element_type=jnp.float32) + b2_ref[...]
        # numerically-stable softplus (matches torch.nn.Softplus); exp/log run
        # on the EUP slot and hide under the MXU, so the extra VPU add of the
        # log(1+x) form vs log1p is noise.
        feat = jnp.maximum(z, 0.0) + jnp.log(1.0 + jnp.exp(-jnp.abs(z)))   # (2R, HF)

        qf = feat[:R]                                                      # (R, HF)
        kf = feat[R:]                                                      # (R, HF)
        mask = mask_ref[...]                                               # (HF, E)

        # --- per-batch KV contraction + context in a short unrolled loop.
        # KV is computed densely as Kf^T @ V -> (HF, E); the block-diagonal
        # head mask zeroes cross-head blocks so Qf @ KV_masked equals the
        # per-head contraction, already stacked lane-dense as (L, E).
        ctx_blocks = []
        for b in range(Bb):
            rows = slice(b * L, (b + 1) * L)        # static, sublane-aligned
            kv = jax.lax.dot_general(kf[rows].astype(cd), v[rows].astype(cd),
                                     (((0,), (0,)), ((), ())),
                                     preferred_element_type=jnp.float32)   # (HF, E)
            kv = kv * mask
            ctx_blocks.append(
                jnp.dot(qf[rows].astype(cd), kv.astype(cd),
                        preferred_element_type=jnp.float32))               # (L, E)
        ctx = ctx_blocks[0] if Bb == 1 else jnp.concatenate(ctx_blocks, axis=0)

        # --- output projection on all Bb*L rows at once.
        out = jnp.dot(ctx.astype(cd), wo_ref[...].astype(cd),
                      preferred_element_type=jnp.float32) + bo_ref[...]
        o_ref[...] = out.reshape(Bb, L, E).astype(o_ref.dtype)

    return kernel


def _cost_estimate(B, L, E, H, F):
    HF = H * F
    flops = 2 * B * L * (3 * E * E       # q/k/v projections
                         + 2 * E * HF    # feature-map layer 1 (stacked Q,K)
                         + 2 * HF * HF   # feature-map layer 2 (stacked Q,K)
                         + HF * E        # Kf^T @ V
                         + HF * E        # Qf @ KV
                         + E * E)        # output projection
    transcendentals = 2 * B * L * HF * 2  # exp + log per softplus element
    bytes_accessed = 4 * (4 * B * L * E                      # activations in/out
                          + 4 * E * E + E * HF + HF * HF     # weights
                          + HF * E                           # head mask
                          + 4 * E + 2 * HF)                  # biases
    return pl.CostEstimate(flops=flops, transcendentals=transcendentals,
                           bytes_accessed=bytes_accessed)


# ----------------------------------------------------------------------------
# One-time parameter preparation (hoisted out of the per-call forward)
# ----------------------------------------------------------------------------
def prepare_params(params, num_heads):
    """Expand per-head feature-map weights into block-diagonal form, build the
    head mask and 2-D biases ONCE per parameter set."""
    if "w1bd" in params:
        return params
    E = params["wq"].shape[0]
    D = E // num_heads
    F = params["fw1"].shape[1]
    HF = num_heads * F
    eye_h = jnp.eye(num_heads, dtype=jnp.float32)
    p = dict(params)
    p["w1bd"] = jnp.kron(eye_h, params["fw1"])                        # (E, HF)
    p["w2bd"] = jnp.kron(eye_h, params["fw2"])                        # (HF, HF)
    p["b1bd"] = jnp.tile(params["fb1"], num_heads).reshape(1, HF)
    p["b2bd"] = jnp.tile(params["fb2"], num_heads).reshape(1, HF)
    p["head_mask"] = jnp.kron(eye_h, jnp.ones((F, D), jnp.float32))   # (HF, E)
    for name in ("bq", "bk", "bv", "bo"):
        p[name + "_2d"] = params[name].reshape(1, E)
    return p


# ----------------------------------------------------------------------------
# Full module forward
# ----------------------------------------------------------------------------
def performer_learnable_attention(query, key, value, params, num_heads, *,
                                  block_batch=None,
                                  compute_dtype=jnp.float32):
    B, L, E = query.shape
    assert key.shape == (B, L, E) and value.shape == (B, L, E)
    head_dim = E // num_heads
    assert head_dim * num_heads == E, "embed_dim must be divisible by num_heads"
    params = prepare_params(params, num_heads)   # no-op if already prepared
    F = params["fw1"].shape[1]
    HF = num_heads * F

    # --- choose how many batch elements to fuse per grid step: fill MXU rows
    # (~256 for v6e/v7x, 128 is plenty on v5e) but keep >= 2 parallel grid
    # steps when B >= 2 so both v7x TensorCores get work.
    if block_batch is None:
        block_batch = max(1, min(B, _TARGET_ROWS // max(L, 1)))
        if B >= 2 and pl.cdiv(B, block_batch) < 2:
            block_batch = pl.cdiv(B, 2)
    Bb = int(block_batch)
    nblk = pl.cdiv(B, Bb)
    Bpad = nblk * Bb
    if Bpad != B:   # pad batch so the grid tiles evenly; sliced off below
        pad = ((0, Bpad - B), (0, 0), (0, 0))
        query = jnp.pad(query, pad)
        key = jnp.pad(key, pad)
        value = jnp.pad(value, pad)

    batch_spec = pl.BlockSpec((Bb, L, E), lambda b: (b, 0, 0))

    def full2d(shape):
        # Constant index_map -> the block is fetched once and stays resident
        # in VMEM across the batch grid.
        # TODO(synk): pipeline_mode=pl.Buffered(1) would halve weight VMEM once
        #             single-buffering is plumbed through pallas_call specs.
        return pl.BlockSpec(shape, lambda b: (0, 0))

    kernel = _make_fused_kernel(Bb, L, compute_dtype)

    out = pl.pallas_call(
        kernel,
        out_shape=jax.ShapeDtypeStruct((Bpad, L, E), jnp.float32),
        grid=(nblk,),
        in_specs=[
            batch_spec, batch_spec, batch_spec,        # query, key, value
            full2d((E, E)), full2d((1, E)),            # wq, bq
            full2d((E, E)), full2d((1, E)),            # wk, bk
            full2d((E, E)), full2d((1, E)),            # wv, bv
            full2d((E, HF)), full2d((1, HF)),          # block-diag W1, b1
            full2d((HF, HF)), full2d((1, HF)),         # block-diag W2, b2
            full2d((HF, E)),                           # head mask
            full2d((E, E)), full2d((1, E)),            # wo, bo
        ],
        out_specs=batch_spec,
        compiler_params=pltpu.CompilerParams(
            dimension_semantics=("parallel",),
            vmem_limit_bytes=48 * 1024 * 1024),
        cost_estimate=_cost_estimate(Bpad, L, E, num_heads, F),
    )(query, key, value,
      params["wq"], params["bq_2d"],
      params["wk"], params["bk_2d"],
      params["wv"], params["bv_2d"],
      params["w1bd"], params["b1bd"], params["w2bd"], params["b2bd"],
      params["head_mask"],
      params["wo"], params["bo_2d"])

    return out[:B] if Bpad != B else out


# ----------------------------------------------------------------------------
# Deterministic parameter init (PyTorch-Linear-style uniform(-1/sqrt(fan_in)))
# Weights stored as (in_features, out_features) so y = x @ W + b.
# ----------------------------------------------------------------------------
def init_params(key, embed_dim, num_heads, num_features):
    head_dim = embed_dim // num_heads

    def lin(k, fan_in, fan_out):
        kw, kb = jax.random.split(k)
        bound = 1.0 / jnp.sqrt(fan_in)
        w = jax.random.uniform(kw, (fan_in, fan_out), jnp.float32, -bound, bound)
        b = jax.random.uniform(kb, (fan_out,), jnp.float32, -bound, bound)
        return w, b

    ks = jax.random.split(key, 6)
    wq, bq = lin(ks[0], embed_dim, embed_dim)
    wk, bk = lin(ks[1], embed_dim, embed_dim)
    wv, bv = lin(ks[2], embed_dim, embed_dim)
    wo, bo = lin(ks[3], embed_dim, embed_dim)
    fw1, fb1 = lin(ks[4], head_dim, num_features)
    fw2, fb2 = lin(ks[5], num_features, num_features)
    return dict(wq=wq, bq=bq, wk=wk, bk=bk, wv=wv, bv=bv, wo=wo, bo=bo,
                fw1=fw1, fb1=fb1, fw2=fw2, fb2=fb2)


# ----------------------------------------------------------------------------
# Pure-JAX reference (mirrors the PyTorch forward) for a correctness check
# ----------------------------------------------------------------------------
def reference_forward(query, key, value, params, num_heads):
    B, L, E = query.shape
    D = E // num_heads
    F = params["fw1"].shape[1]

    def fmap(x):  # (B, L, H, D) -> (B, L, H, F)
        x2 = x.reshape(-1, D)
        h = jax.nn.relu(x2 @ params["fw1"] + params["fb1"])
        z = h @ params["fw2"] + params["fb2"]
        return jax.nn.softplus(z).reshape(B, L, num_heads, F)

    Q = (query @ params["wq"] + params["bq"]).reshape(B, L, num_heads, D)
    K = (key @ params["wk"] + params["bk"]).reshape(B, L, num_heads, D)
    V = (value @ params["wv"] + params["bv"]).reshape(B, L, num_heads, D)
    Qf, Kf = fmap(Q), fmap(K)
    KV = jnp.einsum("blhd,blhe->bhde", Kf, V)
    QKV = jnp.einsum("blhd,bhde->blhe", Qf, KV)
    QKV = QKV.reshape(B, L, E)
    return QKV @ params["wo"] + params["bo"]


if __name__ == "__main__":
    B, L, E, H, F = 8, 8, 32, 2, 128   # head_dim = 16, num_features = 128

    root = jax.random.PRNGKey(0)
    kq, kk, kv_, kp = jax.random.split(root, 4)
    query = jax.random.normal(kq, (B, L, E), jnp.float32)
    key = jax.random.normal(kk, (B, L, E), jnp.float32)
    value = jax.random.normal(kv_, (B, L, E), jnp.float32)

    # kron/tile expansions hoisted: computed once per parameter set, not per call.
    params = prepare_params(init_params(kp, E, H, F), H)

    # f32 compute keeps the 1e-4 check exact; pass compute_dtype=jnp.bfloat16
    # for higher MXU throughput at compute-bound shapes (loosen tolerance).
    out = performer_learnable_attention(query, key, value, params, H)
    out = jax.block_until_ready(out)

    ref = jax.block_until_ready(reference_forward(query, key, value, params, H))
    assert out.shape == (B, L, E)
    assert jnp.allclose(out, ref, atol=1e-4, rtol=1e-4), "mismatch vs reference"

    print("KERNEL_OK")
</pallas_src>

<mosaic_0001>
module attributes {stable_mosaic.version = 11 : i64} {
  func.func @kernel(%arg0: i32, %arg1: memref<4x8x32xf32, #tpu.memory_space<vmem>>, %arg2: memref<4x8x32xf32, #tpu.memory_space<vmem>>, %arg3: memref<4x8x32xf32, #tpu.memory_space<vmem>>, %arg4: memref<32x32xf32, #tpu.memory_space<vmem>>, %arg5: memref<1x32xf32, #tpu.memory_space<vmem>>, %arg6: memref<32x32xf32, #tpu.memory_space<vmem>>, %arg7: memref<1x32xf32, #tpu.memory_space<vmem>>, %arg8: memref<32x32xf32, #tpu.memory_space<vmem>>, %arg9: memref<1x32xf32, #tpu.memory_space<vmem>>, %arg10: memref<32x256xf32, #tpu.memory_space<vmem>>, %arg11: memref<1x256xf32, #tpu.memory_space<vmem>>, %arg12: memref<256x256xf32, #tpu.memory_space<vmem>>, %arg13: memref<1x256xf32, #tpu.memory_space<vmem>>, %arg14: memref<256x32xf32, #tpu.memory_space<vmem>>, %arg15: memref<32x32xf32, #tpu.memory_space<vmem>>, %arg16: memref<1x32xf32, #tpu.memory_space<vmem>>, %arg17: memref<4x8x32xf32, #tpu.memory_space<vmem>>) attributes {dimension_semantics = [#tpu.dimension_semantics<parallel>], iteration_bounds = array<i64: 2>, scalar_prefetch = 0 : i64, scratch_operands = 0 : i64, tpu.core_type = #tpu.core_type<tc>, window_params = [{transform_indices = @transform_0, window_bounds = array<i64: 4, 8, 32>}, {transform_indices = @transform_1, window_bounds = array<i64: 4, 8, 32>}, {transform_indices = @transform_2, window_bounds = array<i64: 4, 8, 32>}, {pipeline_mode = #tpu.pipeline_mode<synchronous>, transform_indices = @transform_3, window_bounds = array<i64: 32, 32>}, {pipeline_mode = #tpu.pipeline_mode<synchronous>, transform_indices = @transform_4, window_bounds = array<i64: 1, 32>}, {pipeline_mode = #tpu.pipeline_mode<synchronous>, transform_indices = @transform_5, window_bounds = array<i64: 32, 32>}, {pipeline_mode = #tpu.pipeline_mode<synchronous>, transform_indices = @transform_6, window_bounds = array<i64: 1, 32>}, {pipeline_mode = #tpu.pipeline_mode<synchronous>, transform_indices = @transform_7, window_bounds = array<i64: 32, 32>}, {pipeline_mode = #tpu.pipeline_mode<synchronous>, transform_indices = @transform_8, window_bounds = array<i64: 1, 32>}, {pipeline_mode = #tpu.pipeline_mode<synchronous>, transform_indices = @transform_9, window_bounds = array<i64: 32, 256>}, {pipeline_mode = #tpu.pipeline_mode<synchronous>, transform_indices = @transform_10, window_bounds = array<i64: 1, 256>}, {pipeline_mode = #tpu.pipeline_mode<synchronous>, transform_indices = @transform_11, window_bounds = array<i64: 256, 256>}, {pipeline_mode = #tpu.pipeline_mode<synchronous>, transform_indices = @transform_12, window_bounds = array<i64: 1, 256>}, {pipeline_mode = #tpu.pipeline_mode<synchronous>, transform_indices = @transform_13, window_bounds = array<i64: 256, 32>}, {pipeline_mode = #tpu.pipeline_mode<synchronous>, transform_indices = @transform_14, window_bounds = array<i64: 32, 32>}, {pipeline_mode = #tpu.pipeline_mode<synchronous>, transform_indices = @transform_15, window_bounds = array<i64: 1, 32>}, {transform_indices = @transform_16, window_bounds = array<i64: 4, 8, 32>}]} {
    %c0 = arith.constant 0 : index
    %c0_0 = arith.constant 0 : index
    %c0_1 = arith.constant 0 : index
    %0 = vector.load %arg1[%c0, %c0_0, %c0_1] : memref<4x8x32xf32, #tpu.memory_space<vmem>>, vector<4x8x32xf32>
    %1 = vector.shape_cast %0 : vector<4x8x32xf32> to vector<32x32xf32>
    %c0_2 = arith.constant 0 : index
    %c0_3 = arith.constant 0 : index
    %c0_4 = arith.constant 0 : index
    %2 = vector.load %arg2[%c0_2, %c0_3, %c0_4] : memref<4x8x32xf32, #tpu.memory_space<vmem>>, vector<4x8x32xf32>
    %3 = vector.shape_cast %2 : vector<4x8x32xf32> to vector<32x32xf32>
    %c0_5 = arith.constant 0 : index
    %c0_6 = arith.constant 0 : index
    %c0_7 = arith.constant 0 : index
    %4 = vector.load %arg3[%c0_5, %c0_6, %c0_7] : memref<4x8x32xf32, #tpu.memory_space<vmem>>, vector<4x8x32xf32>
    %5 = vector.shape_cast %4 : vector<4x8x32xf32> to vector<32x32xf32>
    %c0_8 = arith.constant 0 : index
    %c0_9 = arith.constant 0 : index
    %6 = vector.load %arg4[%c0_8, %c0_9] : memref<32x32xf32, #tpu.memory_space<vmem>>, vector<32x32xf32>
    %cst = arith.constant dense<0.000000e+00> : vector<32x32xf32>
    %7 = tpu.matmul %1, %6, %cst {dimension_numbers = #tpu.dot_dimension_numbers<[1], [0], [0], [1], [0, 0, 1, 1], [], []>} : vector<32x32xf32>, vector<32x32xf32>, vector<32x32xf32> -> vector<32x32xf32>
    %c0_10 = arith.constant 0 : index
    %c0_11 = arith.constant 0 : index
    %8 = vector.load %arg5[%c0_10, %c0_11] : memref<1x32xf32, #tpu.memory_space<vmem>>, vector<1x32xf32>
    %9 = vector.broadcast %8 : vector<1x32xf32> to vector<32x32xf32>
    %10 = arith.addf %7, %9 : vector<32x32xf32>
    %c0_12 = arith.constant 0 : index
    %c0_13 = arith.constant 0 : index
    %11 = vector.load %arg6[%c0_12, %c0_13] : memref<32x32xf32, #tpu.memory_space<vmem>>, vector<32x32xf32>
    %cst_14 = arith.constant dense<0.000000e+00> : vector<32x32xf32>
    %12 = tpu.matmul %3, %11, %cst_14 {dimension_numbers = #tpu.dot_dimension_numbers<[1], [0], [0], [1], [0, 0, 1, 1], [], []>} : vector<32x32xf32>, vector<32x32xf32>, vector<32x32xf32> -> vector<32x32xf32>
    %c0_15 = arith.constant 0 : index
    %c0_16 = arith.constant 0 : index
    %13 = vector.load %arg7[%c0_15, %c0_16] : memref<1x32xf32, #tpu.memory_space<vmem>>, vector<1x32xf32>
    %14 = vector.broadcast %13 : vector<1x32xf32> to vector<32x32xf32>
    %15 = arith.addf %12, %14 : vector<32x32xf32>
    %c0_17 = arith.constant 0 : index
    %c0_18 = arith.constant 0 : index
    %16 = vector.load %arg8[%c0_17, %c0_18] : memref<32x32xf32, #tpu.memory_space<vmem>>, vector<32x32xf32>
    %cst_19 = arith.constant dense<0.000000e+00> : vector<32x32xf32>
    %17 = tpu.matmul %5, %16, %cst_19 {dimension_numbers = #tpu.dot_dimension_numbers<[1], [0], [0], [1], [0, 0, 1, 1], [], []>} : vector<32x32xf32>, vector<32x32xf32>, vector<32x32xf32> -> vector<32x32xf32>
    %c0_20 = arith.constant 0 : index
    %c0_21 = arith.constant 0 : index
    %18 = vector.load %arg9[%c0_20, %c0_21] : memref<1x32xf32, #tpu.memory_space<vmem>>, vector<1x32xf32>
    %19 = vector.broadcast %18 : vector<1x32xf32> to vector<32x32xf32>
    %20 = arith.addf %17, %19 : vector<32x32xf32>
    %21 = tpu.concatenate %10, %15 in 0 : vector<32x32xf32>, vector<32x32xf32> -> vector<64x32xf32>
    %c0_22 = arith.constant 0 : index
    %c0_23 = arith.constant 0 : index
    %22 = vector.load %arg10[%c0_22, %c0_23] : memref<32x256xf32, #tpu.memory_space<vmem>>, vector<32x256xf32>
    %cst_24 = arith.constant dense<0.000000e+00> : vector<64x256xf32>
    %23 = tpu.matmul %21, %22, %cst_24 {dimension_numbers = #tpu.dot_dimension_numbers<[1], [0], [0], [1], [0, 0, 1, 1], [], []>} : vector<64x32xf32>, vector<32x256xf32>, vector<64x256xf32> -> vector<64x256xf32>
    %c0_25 = arith.constant 0 : index
    %c0_26 = arith.constant 0 : index
    %24 = vector.load %arg11[%c0_25, %c0_26] : memref<1x256xf32, #tpu.memory_space<vmem>>, vector<1x256xf32>
    %25 = vector.broadcast %24 : vector<1x256xf32> to vector<64x256xf32>
    %26 = arith.addf %23, %25 : vector<64x256xf32>
    %cst_27 = arith.constant 0.000000e+00 : f32
    %27 = vector.broadcast %cst_27 : f32 to vector<64x256xf32>
    %28 = arith.maximumf %26, %27 : vector<64x256xf32>
    %c0_28 = arith.constant 0 : index
    %c0_29 = arith.constant 0 : index
    %29 = vector.load %arg12[%c0_28, %c0_29] : memref<256x256xf32, #tpu.memory_space<vmem>>, vector<256x256xf32>
    %cst_30 = arith.constant dense<0.000000e+00> : vector<64x256xf32>
    %30 = tpu.matmul %28, %29, %cst_30 {dimension_numbers = #tpu.dot_dimension_numbers<[1], [0], [0], [1], [0, 0, 1, 1], [], []>} : vector<64x256xf32>, vector<256x256xf32>, vector<64x256xf32> -> vector<64x256xf32>
    %c0_31 = arith.constant 0 : index
    %c0_32 = arith.constant 0 : index
    %31 = vector.load %arg13[%c0_31, %c0_32] : memref<1x256xf32, #tpu.memory_space<vmem>>, vector<1x256xf32>
    %32 = vector.broadcast %31 : vector<1x256xf32> to vector<64x256xf32>
    %33 = arith.addf %30, %32 : vector<64x256xf32>
    %cst_33 = arith.constant 0.000000e+00 : f32
    %34 = vector.broadcast %cst_33 : f32 to vector<64x256xf32>
    %35 = arith.maximumf %33, %34 : vector<64x256xf32>
    %36 = math.absf %33 : vector<64x256xf32>
    %cst_34 = arith.constant 0.000000e+00 : f32
    %37 = vector.broadcast %cst_34 : f32 to vector<64x256xf32>
    %38 = arith.subf %37, %36 : vector<64x256xf32>
    %39 = math.exp %38 : vector<64x256xf32>
    %cst_35 = arith.constant 1.000000e+00 : f32
    %40 = vector.broadcast %cst_35 : f32 to vector<64x256xf32>
    %41 = arith.addf %40, %39 : vector<64x256xf32>
    %42 = math.log %41 : vector<64x256xf32>
    %43 = arith.addf %35, %42 : vector<64x256xf32>
    %44 = vector.extract_strided_slice %43 {offsets = [0, 0], sizes = [32, 256], strides = [1, 1]} : vector<64x256xf32> to vector<32x256xf32>
    %45 = vector.extract_strided_slice %43 {offsets = [32, 0], sizes = [32, 256], strides = [1, 1]} : vector<64x256xf32> to vector<32x256xf32>
    %c0_36 = arith.constant 0 : index
    %c0_37 = arith.constant 0 : index
    %46 = vector.load %arg14[%c0_36, %c0_37] : memref<256x32xf32, #tpu.memory_space<vmem>>, vector<256x32xf32>
    %47 = vector.extract_strided_slice %45 {offsets = [0, 0], sizes = [8, 256], strides = [1, 1]} : vector<32x256xf32> to vector<8x256xf32>
    %48 = vector.extract_strided_slice %20 {offsets = [0, 0], sizes = [8, 32], strides = [1, 1]} : vector<32x32xf32> to vector<8x32xf32>
    %cst_38 = arith.constant dense<0.000000e+00> : vector<256x32xf32>
    %49 = tpu.matmul %47, %48, %cst_38 {dimension_numbers = #tpu.dot_dimension_numbers<[0], [0], [1], [1], [0, 1, 1, 1], [], []>} : vector<8x256xf32>, vector<8x32xf32>, vector<256x32xf32> -> vector<256x32xf32>
    %50 = arith.mulf %49, %46 : vector<256x32xf32>
    %51 = vector.extract_strided_slice %44 {offsets = [0, 0], sizes = [8, 256], strides = [1, 1]} : vector<32x256xf32> to vector<8x256xf32>
    %cst_39 = arith.constant dense<0.000000e+00> : vector<8x32xf32>
    %52 = tpu.matmul %51, %50, %cst_39 {dimension_numbers = #tpu.dot_dimension_numbers<[1], [0], [0], [1], [0, 0, 1, 1], [], []>} : vector<8x256xf32>, vector<256x32xf32>, vector<8x32xf32> -> vector<8x32xf32>
    %53 = vector.extract_strided_slice %45 {offsets = [8, 0], sizes = [8, 256], strides = [1, 1]} : vector<32x256xf32> to vector<8x256xf32>
    %54 = vector.extract_strided_slice %20 {offsets = [8, 0], sizes = [8, 32], strides = [1, 1]} : vector<32x32xf32> to vector<8x32xf32>
    %cst_40 = arith.constant dense<0.000000e+00> : vector<256x32xf32>
    %55 = tpu.matmul %53, %54, %cst_40 {dimension_numbers = #tpu.dot_dimension_numbers<[0], [0], [1], [1], [0, 1, 1, 1], [], []>} : vector<8x256xf32>, vector<8x32xf32>, vector<256x32xf32> -> vector<256x32xf32>
    %56 = arith.mulf %55, %46 : vector<256x32xf32>
    %57 = vector.extract_strided_slice %44 {offsets = [8, 0], sizes = [8, 256], strides = [1, 1]} : vector<32x256xf32> to vector<8x256xf32>
    %cst_41 = arith.constant dense<0.000000e+00> : vector<8x32xf32>
    %58 = tpu.matmul %57, %56, %cst_41 {dimension_numbers = #tpu.dot_dimension_numbers<[1], [0], [0], [1], [0, 0, 1, 1], [], []>} : vector<8x256xf32>, vector<256x32xf32>, vector<8x32xf32> -> vector<8x32xf32>
    %59 = vector.extract_strided_slice %45 {offsets = [16, 0], sizes = [8, 256], strides = [1, 1]} : vector<32x256xf32> to vector<8x256xf32>
    %60 = vector.extract_strided_slice %20 {offsets = [16, 0], sizes = [8, 32], strides = [1, 1]} : vector<32x32xf32> to vector<8x32xf32>
    %cst_42 = arith.constant dense<0.000000e+00> : vector<256x32xf32>
    %61 = tpu.matmul %59, %60, %cst_42 {dimension_numbers = #tpu.dot_dimension_numbers<[0], [0], [1], [1], [0, 1, 1, 1], [], []>} : vector<8x256xf32>, vector<8x32xf32>, vector<256x32xf32> -> vector<256x32xf32>
    %62 = arith.mulf %61, %46 : vector<256x32xf32>
    %63 = vector.extract_strided_slice %44 {offsets = [16, 0], sizes = [8, 256], strides = [1, 1]} : vector<32x256xf32> to vector<8x256xf32>
    %cst_43 = arith.constant dense<0.000000e+00> : vector<8x32xf32>
    %64 = tpu.matmul %63, %62, %cst_43 {dimension_numbers = #tpu.dot_dimension_numbers<[1], [0], [0], [1], [0, 0, 1, 1], [], []>} : vector<8x256xf32>, vector<256x32xf32>, vector<8x32xf32> -> vector<8x32xf32>
    %65 = vector.extract_strided_slice %45 {offsets = [24, 0], sizes = [8, 256], strides = [1, 1]} : vector<32x256xf32> to vector<8x256xf32>
    %66 = vector.extract_strided_slice %20 {offsets = [24, 0], sizes = [8, 32], strides = [1, 1]} : vector<32x32xf32> to vector<8x32xf32>
    %cst_44 = arith.constant dense<0.000000e+00> : vector<256x32xf32>
    %67 = tpu.matmul %65, %66, %cst_44 {dimension_numbers = #tpu.dot_dimension_numbers<[0], [0], [1], [1], [0, 1, 1, 1], [], []>} : vector<8x256xf32>, vector<8x32xf32>, vector<256x32xf32> -> vector<256x32xf32>
    %68 = arith.mulf %67, %46 : vector<256x32xf32>
    %69 = vector.extract_strided_slice %44 {offsets = [24, 0], sizes = [8, 256], strides = [1, 1]} : vector<32x256xf32> to vector<8x256xf32>
    %cst_45 = arith.constant dense<0.000000e+00> : vector<8x32xf32>
    %70 = tpu.matmul %69, %68, %cst_45 {dimension_numbers = #tpu.dot_dimension_numbers<[1], [0], [0], [1], [0, 0, 1, 1], [], []>} : vector<8x256xf32>, vector<256x32xf32>, vector<8x32xf32> -> vector<8x32xf32>
    %71 = tpu.concatenate %52, %58, %64, %70 in 0 : vector<8x32xf32>, vector<8x32xf32>, vector<8x32xf32>, vector<8x32xf32> -> vector<32x32xf32>
    %c0_46 = arith.constant 0 : index
    %c0_47 = arith.constant 0 : index
    %72 = vector.load %arg15[%c0_46, %c0_47] : memref<32x32xf32, #tpu.memory_space<vmem>>, vector<32x32xf32>
    %cst_48 = arith.constant dense<0.000000e+00> : vector<32x32xf32>
    %73 = tpu.matmul %71, %72, %cst_48 {dimension_numbers = #tpu.dot_dimension_numbers<[1], [0], [0], [1], [0, 0, 1, 1], [], []>} : vector<32x32xf32>, vector<32x32xf32>, vector<32x32xf32> -> vector<32x32xf32>
    %c0_49 = arith.constant 0 : index
    %c0_50 = arith.constant 0 : index
    %74 = vector.load %arg16[%c0_49, %c0_50] : memref<1x32xf32, #tpu.memory_space<vmem>>, vector<1x32xf32>
    %75 = vector.broadcast %74 : vector<1x32xf32> to vector<32x32xf32>
    %76 = arith.addf %73, %75 : vector<32x32xf32>
    %77 = vector.shape_cast %76 : vector<32x32xf32> to vector<4x8x32xf32>
    %c0_51 = arith.constant 0 : index
    %c0_52 = arith.constant 0 : index
    %c0_53 = arith.constant 0 : index
    %78 = vector.load %arg17[%c0_51, %c0_52, %c0_53] : memref<4x8x32xf32, #tpu.memory_space<vmem>>, vector<4x8x32xf32>
    tpu.vector_store %arg17[%c0_51, %c0_52, %c0_53], %77 {strides = array<i32>} : memref<4x8x32xf32, #tpu.memory_space<vmem>>, vector<4x8x32xf32>,
    return
  }
  func.func @transform_0(%arg0: i32) -> (i32, i32, i32) {
    %c0_i32 = arith.constant 0 : i32
    %c0_i32_0 = arith.constant 0 : i32
    %c0_i32_1 = arith.constant 0 : i32
    return %arg0, %c0_i32, %c0_i32_0 : i32, i32, i32
  }
  func.func @transform_1(%arg0: i32) -> (i32, i32, i32) {
    %c0_i32 = arith.constant 0 : i32
    %c0_i32_0 = arith.constant 0 : i32
    %c0_i32_1 = arith.constant 0 : i32
    return %arg0, %c0_i32, %c0_i32_0 : i32, i32, i32
  }
  func.func @transform_2(%arg0: i32) -> (i32, i32, i32) {
    %c0_i32 = arith.constant 0 : i32
    %c0_i32_0 = arith.constant 0 : i32
    %c0_i32_1 = arith.constant 0 : i32
    return %arg0, %c0_i32, %c0_i32_0 : i32, i32, i32
  }
  func.func @transform_3(%arg0: i32) -> (i32, i32) {
    %c0_i32 = arith.constant 0 : i32
    %c0_i32_0 = arith.constant 0 : i32
    %c0_i32_1 = arith.constant 0 : i32
    return %c0_i32, %c0_i32_0 : i32, i32
  }
  func.func @transform_4(%arg0: i32) -> (i32, i32) {
    %c0_i32 = arith.constant 0 : i32
    %c0_i32_0 = arith.constant 0 : i32
    %c0_i32_1 = arith.constant 0 : i32
    return %c0_i32, %c0_i32_0 : i32, i32
  }
  func.func @transform_5(%arg0: i32) -> (i32, i32) {
    %c0_i32 = arith.constant 0 : i32
    %c0_i32_0 = arith.constant 0 : i32
    %c0_i32_1 = arith.constant 0 : i32
    return %c0_i32, %c0_i32_0 : i32, i32
  }
  func.func @transform_6(%arg0: i32) -> (i32, i32) {
    %c0_i32 = arith.constant 0 : i32
    %c0_i32_0 = arith.constant 0 : i32
    %c0_i32_1 = arith.constant 0 : i32
    return %c0_i32, %c0_i32_0 : i32, i32
  }
  func.func @transform_7(%arg0: i32) -> (i32, i32) {
    %c0_i32 = arith.constant 0 : i32
    %c0_i32_0 = arith.constant 0 : i32
    %c0_i32_1 = arith.constant 0 : i32
    return %c0_i32, %c0_i32_0 : i32, i32
  }
  func.func @transform_8(%arg0: i32) -> (i32, i32) {
    %c0_i32 = arith.constant 0 : i32
    %c0_i32_0 = arith.constant 0 : i32
    %c0_i32_1 = arith.constant 0 : i32
    return %c0_i32, %c0_i32_0 : i32, i32
  }
  func.func @transform_9(%arg0: i32) -> (i32, i32) {
    %c0_i32 = arith.constant 0 : i32
    %c0_i32_0 = arith.constant 0 : i32
    %c0_i32_1 = arith.constant 0 : i32
    return %c0_i32, %c0_i32_0 : i32, i32
  }
  func.func @transform_10(%arg0: i32) -> (i32, i32) {
    %c0_i32 = arith.constant 0 : i32
    %c0_i32_0 = arith.constant 0 : i32
    %c0_i32_1 = arith.constant 0 : i32
    return %c0_i32, %c0_i32_0 : i32, i32
  }
  func.func @transform_11(%arg0: i32) -> (i32, i32) {
    %c0_i32 = arith.constant 0 : i32
    %c0_i32_0 = arith.constant 0 : i32
    %c0_i32_1 = arith.constant 0 : i32
    return %c0_i32, %c0_i32_0 : i32, i32
  }
  func.func @transform_12(%arg0: i32) -> (i32, i32) {
    %c0_i32 = arith.constant 0 : i32
    %c0_i32_0 = arith.constant 0 : i32
    %c0_i32_1 = arith.constant 0 : i32
    return %c0_i32, %c0_i32_0 : i32, i32
  }
  func.func @transform_13(%arg0: i32) -> (i32, i32) {
    %c0_i32 = arith.constant 0 : i32
    %c0_i32_0 = arith.constant 0 : i32
    %c0_i32_1 = arith.constant 0 : i32
    return %c0_i32, %c0_i32_0 : i32, i32
  }
  func.func @transform_14(%arg0: i32) -> (i32, i32) {
    %c0_i32 = arith.constant 0 : i32
    %c0_i32_0 = arith.constant 0 : i32
    %c0_i32_1 = arith.constant 0 : i32
    return %c0_i32, %c0_i32_0 : i32, i32
  }
  func.func @transform_15(%arg0: i32) -> (i32, i32) {
    %c0_i32 = arith.constant 0 : i32
    %c0_i32_0 = arith.constant 0 : i32
    %c0_i32_1 = arith.constant 0 : i32
    return %c0_i32, %c0_i32_0 : i32, i32
  }
  func.func @transform_16(%arg0: i32) -> (i32, i32, i32) {
    %c0_i32 = arith.constant 0 : i32
    %c0_i32_0 = arith.constant 0 : i32
    %c0_i32_1 = arith.constant 0 : i32
    return %arg0, %c0_i32, %c0_i32_0 : i32, i32, i32
  }
}

</mosaic_0001>

<bundles_post_ra>
// kernel: tpu_custom_call.1
= control target key start
LH: loop header
LB: loop body
LE: loop exit
PB: predicated region body
PF: predicated region fallthrough
CT: control target
= control target key end

     0   :  { %s4724_s0 = inlined_call_operand.vmem [shape: f32[8,8,32], index: 0, kind: input, shape index: {}]   ;;  %s4725_s1 = inlined_call_operand.vmem [shape: f32[8,8,32], index: 1, kind: input, shape index: {}]   ;;  %s4726_s2 = inlined_call_operand.vmem [shape: f32[8,8,32], index: 2, kind: input, shape index: {}]   ;;  %s4727_s3 = inlined_call_operand.vmem [shape: f32[32,32], index: 3, kind: input, shape index: {}]   ;;  %s4728_s4 = inlined_call_operand.vmem [shape: f32[1,32], index: 4, kind: input, shape index: {}]   ;;  %s4729_s5 = inlined_call_operand.vmem [shape: f32[32,32], index: 5, kind: input, shape index: {}]   ;;  %s4730_s6 = inlined_call_operand.hbm [shape: f32[1,32], index: 6, kind: input, shape index: {}]   ;;  %s4731_s7 = inlined_call_operand.hbm [shape: f32[32,32], index: 7, kind: input, shape index: {}]   ;;  %s4732_s8 = inlined_call_operand.vmem [shape: f32[1,32], index: 8, kind: input, shape index: {}]   ;;  %s4733_s9 = inlined_call_operand.vmem [shape: f32[32,256], index: 9, kind: input, shape index: {}]   ;;  %s4734_s10 = inlined_call_operand.vmem [shape: f32[1,256], index: 10, kind: input, shape index: {}]   ;;  %s4735_s11 = inlined_call_operand.hbm [shape: f32[256,256], index: 11, kind: input, shape index: {}]   ;;  %s4736_s12 = inlined_call_operand.vmem [shape: f32[1,256], index: 12, kind: input, shape index: {}]   ;;  %s4737_s13 = inlined_call_operand.vmem [shape: f32[256,32], index: 13, kind: input, shape index: {}]   ;;  %s4738_s14 = inlined_call_operand.hbm [shape: f32[32,32], index: 14, kind: input, shape index: {}]   ;;  %s4739_s15 = inlined_call_operand.vmem [shape: f32[1,32], index: 15, kind: input, shape index: {}]   ;;  %s4740_s16 = inlined_call_operand.hbm [shape: f32[8,8,32], index: 16, kind: output, shape index: {}]  }
   0x1   :  { %4762 = sst [smem:[#allocation49_spill]] %s4724_s0 }
   0x2   :  { %4763 = sst [smem:[#allocation50_spill]] %s4730_s6 }
   0x3   :  { %4764 = sst [smem:[#allocation51_spill]] %s4731_s7 }
   0x4   :  { %4765 = sst [smem:[#allocation52_spill]] %s4739_s15 }
   0x5   :  { %4766 = sst [smem:[#allocation53_spill]] %s4740_s16 }
   0x6   :  { %21 = vsyncpa [#allocation3], 0 }
   0x7   :  { %22 = vsyncpa [#allocation6], 0 }
   0x8   :  { %23 = vsyncpa [#allocation9], 0 }
   0x9   :  { %24 = vsyncpa [#allocation4], 0 }
   0xa   :  { %26 = vsyncpa [#allocation4 + $0x1], 0  ;;  %s3579_s21 = smov 0   ;;  %s3581_s22 = smov 0  }
   0xb   :  { %s3583_s23 = smov 0   ;;  %s3585_s24 = smov 0  }
   0xc LB: > { %4767 = sst [smem:[#allocation15_spill]] %s3470_s21  ;;  %s3600_s25 = sadd.s32 4294967295, %s3482_s24   ;;  %s3482_s24 = sphi %s3585_s24, %s4842_s24   ;;  %s3478_s23 = sphi %s3583_s23, %s4845_s23   ;;  %s3474_s22 = sphi %s3581_s22, %s4844_s22   ;;  %s3470_s21 = sphi %s3579_s21, %s4843_s21  }
   0xd   : > { %4768 = sst [smem:[#allocation16_spill]] %s3474_s22  ;;  %s2915_s26 = sadd.s32 4294967294, %s3482_s24  }
   0xe   : > { %4769 = sst [smem:[#allocation17_spill]] %s3478_s23  ;;  %s3604_s27 = sadd.s32 1, %s3482_s24  }
   0xf   : > { %4770 = sst [smem:[#allocation18_spill]] %s3482_s24  ;;  %s390_s28 = sadd.s32 1, %s3478_s23 }
  0x10   : > { %4771 = sst [smem:[#allocation19_spill]] %s3604_s27  ;;  %s387_s29 = ssub.s32 %s3482_s24, %s3604_s27 }
  0x11   : > { %p400_p0 = scmp.ne.s32.totalorder %s3478_s23, %s3474_s22  ;;  %p388_p1 = scmp.eq.s32.totalorder %s387_s29, 0 }
  0x12   : > { %p401_p2 = scmp.eq.s32.totalorder %s3600_s25, 1  ;;  %p406_p3 = scmp.ne.s32.totalorder %s3474_s22, %s3470_s21 }
  0x13   : > { %p407_p4 = scmp.eq.s32.totalorder %s2915_s26, 1  ;;  %p2916_p7 = scmp.ge.s32.totalorder %s3482_s24, 1 }
  0x14   : > { %s3615_s30 = scalar_select %p388_p1, %s3478_s23, %s390_s28  }
  0x15   : > { %p3617_p5 = por %p401_p2, %p400_p0  ;;  %p3621_p6 = por %p407_p4, %p406_p3 }
  0x16   : > { %4772 = sst [smem:[#allocation20_spill]] %s3615_s30  ;;  %p414_p8 = scmp.lt.s32.totalorder %s3482_s24, 3 }
  0x17   : > { %s4773_s0 = scalar_select %p3617_p5, 1, 0 }
  0x18   : > { %s4775_s17 = scalar_select %p3621_p6, 1, 0 }
  0x19   : > { %4774 = sst [smem:[#allocation21_spill]] %s4773_s0  ;;  %p3152_p9 = scmp.eq.s32.totalorder %s3600_s25, 0 }
  0x1a   : > { %4776 = sst [smem:[#allocation22_spill]] %s4775_s17  ;;  %p3628_p10 = pnand %p2916_p7, %p414_p8 }
  0x1b   : > { %s4778_s7 = sld [smem:[#allocation51_spill]]  ;;  %s3484_s28 = smov [#allocation5]  }
  0x1c   : > { %p3135_p11 = pneg %p3628_p10  ;;  %s448_s29 = sshll.u32 %s3484_s28, 4  ;;  %s449_s29 = int_to_ptr.vmem [resolvable:$true] %s448_s29 }
  0x1d   : > { %s4780_s6 = sld [smem:[#allocation50_spill]]  ;;  %s3485_s19 = smov 128  }
  0x1e   : > { %p3639_p12 = pnand %p3152_p9, %p3135_p11  ;;  %s3486_s20 = smov 8  }
  0x1f   : > { %s469_s16 = sshll.u32 %s4735_s11, 4  ;;  %s3488_s23 = smov [#allocation7]   ;;  %s470_s16 = int_to_ptr.hbm [resolvable:$true] %s469_s16 }
  0x20   : > { %s471_s27 = sshll.u32 %s3488_s23, 4  ;;  %s489_s15 = sshll.u32 %s4738_s14, 4  ;;  %s472_s27 = int_to_ptr.vmem [resolvable:$true] %s471_s27  ;;  %s490_s15 = int_to_ptr.hbm [resolvable:$true] %s489_s15 }
  0x21   : > { %s446_s26 = sshll.u32 %s4778_s7, 4  ;;  %s3487_s7 = smov [#allocation2]   ;;  %s447_s26 = int_to_ptr.hbm [resolvable:$true] %s446_s26 }
  0x22   : > { %3141 = dma.hbm_to_vmem [thread:$0]  (!%p3639_p12), %s447_s26, 512, %s449_s29, [#allocation6], %s3485_s19, %s3485_s19, %s3486_s20  }
  0x23   : > { %s435_s17 = sshll.u32 %s4780_s6, 4  ;;  %s437_s28 = sshll.u32 %s3487_s7, 4  ;;  %s436_s17 = int_to_ptr.hbm [resolvable:$true] %s435_s17  ;;  %s438_s28 = int_to_ptr.vmem [resolvable:$true] %s437_s28 }
  0x24   : > { %3138 = dma.hbm_to_vmem [thread:$0]  (!%p3639_p12), %s436_s17, 16, %s438_s28, [#allocation3]  }
  0x25   : > { %s3489_s22 = smov 256   ;;  %s3490_s26 = smov 16  }
  0x26   : > { %3144 = dma.hbm_to_vmem [thread:$0]  (!%p3639_p12), %s470_s16, 8192, %s472_s27, [#allocation6], %s3489_s22, %s3489_s22, %s3490_s26  }
  0x27   : > { %s3491_s7 = smov [#allocation8]   ;;  %537 = sbr.rel (%p3628_p10) target bundleno = 2013 (0x7dd), region = 84 }
  0x28   : > { %s491_s21 = sshll.u32 %s3491_s7, 4  ;;  %s492_s21 = int_to_ptr.vmem [resolvable:$true] %s491_s21 }
  0x29   : > { %3147 = dma.hbm_to_vmem [thread:$0]  (!%p3639_p12), %s490_s15, 512, %s492_s21, [#allocation9], %s3485_s19, %s3485_s19, %s3486_s20  }
  0x2c   : > { %3453 = dma.done.wait (%p3152_p9), [#allocation3], 16  }
  0x2d   : > { %3455 = vsyncadd (%p3152_p9), [#allocation3], 4294967280 }
  0x2e   : > { %3457 = dma.done.wait (%p3152_p9), [#allocation6], 8704  }
  0x2f   : > { %3459 = vsyncadd (%p3152_p9), [#allocation6], 4294958592 }
  0x30   : > { %3461 = dma.done.wait (%p3152_p9), [#allocation9], 512  }
  0x31   : > { %3463 = vsyncadd (%p3152_p9), [#allocation9], 4294966784  ;;  %s2928_s6 = sshll.u32 %s3600_s25, 2  ;;  %v647_v0 = vld [vmem:[%s4727_s3 + $0x18] sm:$0xff]  ;;  %v646_v1 = vld [vmem:[%s4727_s3 + $0x10] sm:$0xff]  ;;  %s4781_s19 = sld [smem:[#allocation49_spill]] }
  0x32   : > { %p614_p13 = scmp.lt.s32.totalorder %s2928_s6, 7  ;;  %677 = vmatpush.msra.mxu0 %v647_v0  ;;  %v645_v2 = vld [vmem:[%s4727_s3 + $0x8] sm:$0xff]  ;;  %v697_v3 = vld [vmem:[%s4729_s5 + $0x18] sm:$0xff]  ;;  %v696_v4 = vld [vmem:[%s4729_s5 + $0x10] sm:$0xff]  ;;  %vm652_vm0 = vcmask 261120   ;;  %vm1402_vm1 = vcmask 64512  }
  0x33   : > { %726 = vmatpush.msra.mxu1 %v697_v3  ;;  %v644_v5 = vld [vmem:[%s4727_s3] sm:$0xff]  ;;  %v695_v6 = vld [vmem:[%s4729_s5 + $0x8] sm:$0xff]  ;;  %v798_v9 = vld [vmem:[%s4733_s9 + $0x30] sm:$0xff]  ;;  %s3099_s27 = sshll.u32 %s3600_s25, 5  ;;  %s4837_s21 = sld [smem:[#allocation53_spill]] }
  0x34   : > { %s4847_s6 = smov (!%p614_p13, %s2928_s6), 7  ;;  %678 = vmatpush.msra.mxu0 %v646_v1  ;;  %v694_v8 = vld [vmem:[%s4729_s5] sm:$0xff]  ;;  %842 = vmatpush.msra.mxu3 %v798_v9  ;;  %v799_v10 = vld [vmem:[%s4733_s9 + $0x38] sm:$0xff]  ;;  %v797_v13 = vld [vmem:[%s4733_s9 + $0x28] sm:$0xff] }
  0x35   : > { %s3675_s15 = sshll.u32 %s4847_s6, 3  ;;  %727 = vmatpush.msra.mxu1 %v696_v4  ;;  %v796_v11 = vld [vmem:[%s4733_s9 + $0x20] sm:$0xff]  ;;  %v794_v20 = vld [vmem:[%s4733_s9 + $0x10] sm:$0xff]  ;;  %v795_v21 = vld [vmem:[%s4733_s9 + $0x18] sm:$0xff] }
  0x36   : > { %s623_s30 = scalar_lea.vmem %s4725_s1, %s3675_s15  ;;  %679 = vmatpush.msra.mxu0 %v645_v2  ;;  %843 = vmatpush.msra.mxu3 %v796_v11  ;;  %v792_v22 = vld [vmem:[%s4733_s9] sm:$0xff]  ;;  %v793_v23 = vld [vmem:[%s4733_s9 + $0x8] sm:$0xff]  ;;  %v745_v37 = vld [vmem:[#allocation5 + $0x10] sm:$0xff]  ;;  %s3764_s28 = scalar_lea.vmem %s4726_s2, %s3675_s15 }
  0x37   : > { %s3690_s20 = scalar_lea.vmem %s4781_s19, %s3675_s15  ;;  %728 = vmatpush.msra.mxu1 %v695_v6  ;;  %v636_v12 = vld [vmem:[%s623_s30] sm:$0xff]  ;;  %v637_v15 = vld [vmem:[%s623_s30 + $0x8] sm:$0xff]  ;;  %v638_v17 = vld [vmem:[%s623_s30 + $0x10] sm:$0xff] }
  0x38   : > { %v632_v7 = vld [vmem:[%s3690_s20] sm:$0xff]  ;;  %680 = vmatpush.msra.mxu0 %v644_v5  ;;  %v633_v14 = vld [vmem:[%s3690_s20 + $0x8] sm:$0xff]  ;;  %v634_v16 = vld [vmem:[%s3690_s20 + $0x10] sm:$0xff]  ;;  %844 = vmatpush.msra.mxu3 %v794_v20 }
  0x39   : > { %2934 = vmatmul.msk.f32.vlgmr.msra.gmra.mxu0 %vm652_vm0, %v632_v7  ;;  %729 = vmatpush.msra.mxu1 %v694_v8  ;;  %v635_v18 = vld [vmem:[%s3690_s20 + $0x18] sm:$0xff]  ;;  %v3204_v24 = vld [vmem:[%s4728_s4] ss:$0 sm:$0xff]  ;;  %v989_v38 = vld [vmem:[#allocation7 + $0x1e8] sm:$0xff]  ;;  %s4838_s6 = smov %s4837_s21  ;;  %s2784_s16 = scalar_lea.hbm %s4837_s21, %s3099_s27 }
  0x3a   : > { %883 = vmatpush.msrb.mxu0 %v799_v10  ;;  %2938 = vmatmul.msk.f32.vlgmr.msra.gmra.mxu1 %vm652_vm0, %v636_v12  ;;  %v639_v19 = vld [vmem:[%s623_s30 + $0x18] sm:$0xff]  ;;  %v3756_v34 = vld [vmem:[#allocation2] ss:$0 sm:$0xff]  ;;  %v744_v39 = vld [vmem:[#allocation5 + $0x8] sm:$0xff]  ;;  %s4834_s30 = sld [smem:[#allocation16_spill]]  ;;  %s2787_s24 = sshll.u32 %s2784_s16, 4  ;;  %s2788_s24 = int_to_ptr.hbm [resolvable:$true] %s2787_s24 }
  0x3b   : > { %845 = vmatpush.msra.mxu3 %v792_v22  ;;  %v746_v35 = vld [vmem:[#allocation5 + $0x18] sm:$0xff]  ;;  %v958_v41 = vld [vmem:[#allocation7 + $0xf0] sm:$0xff]  ;;  %v956_v43 = vld [vmem:[#allocation7 + $0xe0] sm:$0xff]  ;;  %s3422_s20 = sshra.s32 %s2788_s24, 4  ;;  %s3428_s29 = scalar_lea.hbm %s4838_s6, 64  ;;  %s3423_s20 = int_to_ptr.hbm [resolvable:$true] %s3422_s20 }
  0x3c   : > { %884 = vmatpush.msrb.mxu0 %v797_v13  ;;  %v991_v36 = vld [vmem:[#allocation7 + $0x1f8] sm:$0xff]  ;;  %775 = vmatpush.msra.mxu2 %v746_v35  ;;  %v743_v45 = vld [vmem:[#allocation5] sm:$0xff]  ;;  %v985_v46 = vld [vmem:[#allocation7 + $0x1c8] sm:$0xff]  ;;  %p3429_p3 = scmp.lt.s32.totalorder %s3423_s20, %s4838_s6 }
  0x3d   : > { %v987_v40 = vld [vmem:[#allocation7 + $0x1d8] sm:$0xff]  ;;  %998 = vmatpush.msrb.mxu1 %v958_v41  ;;  %v957_v47 = vld [vmem:[#allocation7 + $0xe8] sm:$0xff]  ;;  %v3768_v51 = vld [vmem:[#allocation7 + $0x1f0] sm:$0xff] }
  0x3e   : > { %885 = vmatpush.msrb.mxu0 %v795_v21  ;;  %v959_v42 = vld [vmem:[#allocation7 + $0xf8] sm:$0xff]  ;;  %776 = vmatpush.msra.mxu2 %v745_v37  ;;  %v954_v52 = vld [vmem:[#allocation7 + $0xd0] sm:$0xff]  ;;  %v981_v54 = vld [vmem:[#allocation7 + $0x1a8] sm:$0xff] }
  0x3f   : > { %1080 = vmatpush.msrb.mxu3 %v959_v42  ;;  %v640_v49 = vld [vmem:[%s3764_s28] sm:$0xff]  ;;  %999 = vmatpush.msrb.mxu1 %v956_v43  ;;  %v953_v57 = vld [vmem:[#allocation7 + $0xc8] sm:$0xff]  ;;  %v3776_v59 = vld [vmem:[#allocation7 + $0x1d0] sm:$0xff] }
  0x40   : > { %886 = vmatpush.msrb.mxu0 %v793_v23  ;;  %777 = vmatpush.msra.mxu2 %v744_v39  ;;  %v983_v50 = vld [vmem:[#allocation7 + $0x1b8] sm:$0xff]  ;;  %v3773_v55 = vld [vmem:[#allocation7 + $0x1e0] sm:$0xff]  ;;  %v950_v60 = vld [vmem:[#allocation7 + $0xb0] sm:$0xff]  ;;  %s610_s17 = sand.u32 1, %s4834_s30   ;;  %s3424_s30 = scalar_lea.hbm %s3423_s20, 32 }
  0x41   : > { %2935 = vmatmul.msk.f32.gmra.mxu0 %vm652_vm0, %v633_v14  ;;  %1081 = vmatpush.msrb.mxu3 %v957_v47  ;;  %v955_v53 = vld [vmem:[#allocation7 + $0xd8] sm:$0xff]  ;;  %v952_v56 = vld [vmem:[#allocation7 + $0xc0] sm:$0xff]  ;;  %v977_v63 = vld [vmem:[#allocation7 + $0x188] sm:$0xff]  ;;  %s2927_s18 = sshll.u32 %s610_s17, 5  ;;  %s2773_s0 = scalar_lea.sflag [#allocation4], %s610_s17 }
  0x42   : > { %2939 = vmatmul.msk.f32.gmra.mxu1 %vm652_vm0, %v637_v15  ;;  %1121 = vmatpush.msra.mxu0 %v991_v36  ;;  %v979_v58 = vld [vmem:[#allocation7 + $0x198] sm:$0xff]  ;;  %v3781_v0 = vld [vmem:[#allocation7 + $0x1c0] sm:$0xff]  ;;  %v949_v4 = vld [vmem:[#allocation7 + $0xa8] sm:$0xff]  ;;  %s612_s15 = scalar_lea.vmem [#allocation10], %s2927_s18  ;;  %p3425_p0 = scmp.ne.s32.totalorder %s3423_s20, %s3424_s30 }
  0x43   : > { %778 = vmatpush.msra.mxu2 %v743_v45  ;;  %1000 = vmatpush.msrb.mxu1 %v954_v52  ;;  %v951_v62 = vld [vmem:[#allocation7 + $0xb8] sm:$0xff]  ;;  %v948_v1 = vld [vmem:[#allocation7 + $0xa0] sm:$0xff]  ;;  %v3786_v5 = vld [vmem:[#allocation7 + $0x1b0] sm:$0xff]  ;;  %s2785_s22 = sshll.u32 %s612_s15, 4  ;;  %p3430_p4 = scmp.lt.s32.totalorder %s3428_s29, %s3424_s30  ;;  %s2786_s22 = int_to_ptr.vmem [resolvable:$true] %s2785_s22 }
  0x44   : > { %1122 = vmatpush.msra.mxu0 %v989_v38  ;;  %2942 = vmatmul.msk.f32.vlgmr.msra.gmra.mxu2 %vm652_vm0, %v640_v49  ;;  %v641_v3 = vld [vmem:[%s3764_s28 + $0x8] sm:$0xff]  ;;  %v975_v6 = vld [vmem:[#allocation7 + $0x178] sm:$0xff]  ;;  %v946_v7 = vld [vmem:[#allocation7 + $0x90] sm:$0xff]  ;;  %p3426_p1 = pnand %p3425_p0, %p3617_p5 }
  0x45   : > { %3100 = vmatpush.msrb.mxu2 %v3768_v51  ;;  %1082 = vmatpush.msrb.mxu3 %v955_v53  ;;  %v947_v8 = vld [vmem:[#allocation7 + $0x98] sm:$0xff]  ;;  %v3790_v9 = vld [vmem:[#allocation7 + $0x1a0] sm:$0xff]  ;;  %v973_v10 = vld [vmem:[#allocation7 + $0x168] sm:$0xff]  ;;  %p3431_p7 = por %p3430_p4, %p3429_p3 }
  0x46   : > { %1123 = vmatpush.msra.mxu0 %v987_v40  ;;  %1001 = vmatpush.msrb.mxu1 %v952_v56  ;;  %v944_v11 = vld [vmem:[#allocation7 + $0x80] sm:$0xff]  ;;  %v945_v12 = vld [vmem:[#allocation7 + $0x88] sm:$0xff]  ;;  %v3794_v14 = vld [vmem:[#allocation7 + $0x190] sm:$0xff]  ;;  %p3427_p2 = pneg %p3426_p1 }
  0x47   : > { %3101 = vmatpush.msrb.mxu2 %v3773_v55  ;;  %1083 = vmatpush.msrb.mxu3 %v953_v57  ;;  %v971_v15 = vld [vmem:[#allocation7 + $0x158] sm:$0xff]  ;;  %v642_v20 = vld [vmem:[%s3764_s28 + $0x10] sm:$0xff]  ;;  %v940_v21 = vld [vmem:[#allocation7 + $0x60] sm:$0xff] }
  0x48   : > { %1124 = vmatpush.msra.mxu0 %v985_v46  ;;  %1002 = vmatpush.msrb.mxu1 %v950_v60  ;;  %v3804_v23 = vld [vmem:[#allocation7 + $0x170] sm:$0xff]  ;;  %v968_v36 = vld [vmem:[#allocation7 + $0x140] sm:$0xff]  ;;  %v935_v37 = vld [vmem:[#allocation7 + $0x38] sm:$0xff]  ;;  %p3432_p8 = pnand %p3431_p7, %p3427_p2 }
  0x49   : > { %2936 = vmatmul.msk.f32.gmra.mxu0 %vm652_vm0, %v634_v16  ;;  %3102 = vmatpush.msrb.mxu2 %v3776_v59  ;;  %v942_v16 = vld [vmem:[#allocation7 + $0x70] sm:$0xff]  ;;  %v961_v38 = vld [vmem:[#allocation7 + $0x108] sm:$0xff]  ;;  %v932_v40 = vld [vmem:[#allocation7 + $0x20] sm:$0xff] }
  0x4a   : > { %2940 = vmatmul.msk.f32.gmra.mxu1 %vm652_vm0, %v638_v17  ;;  %1125 = vmatpush.msra.mxu0 %v983_v50  ;;  %v3797_v17 = vld [vmem:[#allocation7 + $0x180] sm:$0xff]  ;;  %v934_v35 = vld [vmem:[#allocation7 + $0x30] sm:$0xff]  ;;  %v933_v42 = vld [vmem:[#allocation7 + $0x28] sm:$0xff] }
  0x4b   : > { %1084 = vmatpush.msrb.mxu3 %v951_v62  ;;  %3103 = vmatpush.msrb.mxu2 %v3781_v0  ;;  %v643_v39 = vld [vmem:[%s3764_s28 + $0x18] sm:$0xff]  ;;  %v928_v46 = vld [vmem:[#allocation7] sm:$0xff]  ;;  %v800_v50 = vld [vmem:[%s4734_s10] sm:$0x3]  ;;  %s4835_s28 = sld [smem:[#allocation52_spill]] }
  0x4c   : > { %1126 = vmatpush.msra.mxu0 %v981_v54  ;;  %1003 = vmatpush.msrb.mxu1 %v948_v1  ;;  %v966_v41 = vld [vmem:[#allocation7 + $0x130] sm:$0xff]  ;;  %v931_v45 = vld [vmem:[#allocation7 + $0x18] sm:$0xff]  ;;  %v960_v49 = vld [vmem:[#allocation7 + $0x100] sm:$0xff] }
  0x4d   : > { %2943 = vmatmul.msk.f32.gmra.mxu2 %vm652_vm0, %v641_v3  ;;  %1085 = vmatpush.msrb.mxu3 %v949_v4  ;;  %v930_v43 = vld [vmem:[#allocation7 + $0x10] sm:$0xff] }
  0x4e   : > { %1127 = vmatpush.msra.mxu0 %v979_v58  ;;  %3104 = vmatpush.msrb.mxu2 %v3786_v5  ;;  %v962_v47 = vld [vmem:[#allocation7 + $0x110] sm:$0xff] }
  0x4f   : > { %1004 = vmatpush.msrb.mxu1 %v946_v7  ;;  %1086 = vmatpush.msrb.mxu3 %v947_v8 }
  0x50   : > { %1128 = vmatpush.msra.mxu0 %v977_v63  ;;  %3105 = vmatpush.msrb.mxu2 %v3790_v9 }
  0x51   : > { %2937 = vmatmul.msk.f32.gmra.mxu0 %vm652_vm0, %v635_v18  ;;  %1005 = vmatpush.msrb.mxu1 %v944_v11  ;;  %v943_v18 = vld [vmem:[#allocation7 + $0x78] sm:$0xff] }
  0x52   : > { %2941 = vmatmul.msk.f32.gmra.mxu1 %vm652_vm0, %v639_v19  ;;  %1129 = vmatpush.msra.mxu0 %v975_v6  ;;  %v969_v19 = vld [vmem:[#allocation7 + $0x148] sm:$0xff] }
  0x53   : > { %1087 = vmatpush.msrb.mxu3 %v945_v12  ;;  %3106 = vmatpush.msrb.mxu2 %v3794_v14 }
  0x54   : > { %1130 = vmatpush.msra.mxu0 %v973_v10  ;;  %1006 = vmatpush.msrb.mxu1 %v942_v16 }
  0x55   : > { %3107 = vmatpush.msrb.mxu2 %v3797_v17  ;;  %1088 = vmatpush.msrb.mxu3 %v943_v18 }
  0x56   : > { %1131 = vmatpush.msra.mxu0 %v971_v15  ;;  %2944 = vmatmul.msk.f32.gmra.mxu2 %vm652_vm0, %v642_v20 }
  0x57   : > { %1007 = vmatpush.msrb.mxu1 %v940_v21  ;;  %3108 = vmatpush.msrb.mxu2 %v3804_v23 }
  0x58   : > { %1132 = vmatpush.msra.mxu0 %v969_v19 }
  0x5e   : > { %2945 = vmatmul.msk.f32.gmra.mxu2 %vm652_vm0, %v643_v39 }
  0xb6   : > { %v682_v25 = vpop.f32.mrf.mxu0 }
  0xb7   : > { %v683_v26 = vadd.f32 %v3204_v24, %v682_v25  ;;  %v731_v31 = vpop.f32.mrf.mxu1  ;;  %v967_v25 = vld [vmem:[#allocation7 + $0x138] sm:$0xff] }
  0xb8   : > { %v732_v44 = vadd.f32 %v3756_v34, %v731_v31  ;;  %1133 = vmatpush.msra.mxu0 %v967_v25  ;;  %v936_v31 = vld [vmem:[#allocation7 + $0x40] sm:$0xff] }
  0xb9   : > { %2946 = vmatmul.msk.f32.vlgmr.msra.gmra.mxu3 %vm652_vm0, %v683_v26  ;;  %2954 = vmatmul.msk.f32.vlgmr.msrb.gmra.mxu0 %vm652_vm0, %v683_v26 }
  0xbe   : > { %v685_v27 = vpop.f32.mrf.mxu0 }
  0xbf   : > { %v686_v28 = vadd.f32 %v3204_v24, %v685_v27  ;;  %v734_v48 = vpop.f32.mrf.mxu1  ;;  %v938_v27 = vld [vmem:[#allocation7 + $0x50] sm:$0xff] }
  0xc0   : > { %v735_v61 = vadd.f32 %v3756_v34, %v734_v48  ;;  %1008 = vmatpush.msrb.mxu1 %v938_v27  ;;  %v929_v48 = vld [vmem:[#allocation7 + $0x8] sm:$0xff] }
  0xc1   : > { %2947 = vmatmul.msk.f32.gmra.mxu3 %vm652_vm0, %v686_v28  ;;  %2955 = vmatmul.msk.f32.gmra.mxu0 %vm652_vm0, %v686_v28  ;;  %v972_v28 = vld [vmem:[#allocation7 + $0x160] sm:$0xff] }
  0xc2   : > { %3109 = vmatpush.msrb.mxu2 %v972_v28  ;;  %1009 = vmatpush.msrb.mxu1 %v936_v31 }
  0xc4   : > { %1010 = vmatpush.msrb.mxu1 %v934_v35 }
  0xc6   : > { %v688_v29 = vpop.f32.mrf.mxu0  ;;  %1011 = vmatpush.msrb.mxu1 %v932_v40 }
  0xc7   : > { %v689_v30 = vadd.f32 %v3204_v24, %v688_v29  ;;  %v737_v2 = vpop.f32.mrf.mxu1  ;;  %v939_v29 = vld [vmem:[#allocation7 + $0x58] sm:$0xff] }
  0xc8   : > { %v738_v13 = vadd.f32 %v3756_v34, %v737_v2  ;;  %1012 = vmatpush.msrb.mxu1 %v930_v43 }
  0xc9   : > { %2948 = vmatmul.msk.f32.gmra.mxu3 %vm652_vm0, %v689_v30  ;;  %2956 = vmatmul.msk.f32.gmra.mxu0 %vm652_vm0, %v689_v30  ;;  %v965_v30 = vld [vmem:[#allocation7 + $0x128] sm:$0xff] }
  0xca   : > { %1134 = vmatpush.msra.mxu0 %v965_v30  ;;  %1013 = vmatpush.msrb.mxu1 %v928_v46 }
  0xcc   : > { %1039 = vmatpush.msra.mxu1 %v3768_v51  ;;  %v3825_v51 = vperm.slane %v800_v50, 1 }
  0xce   : > { %v691_v32 = vpop.f32.mrf.mxu0  ;;  %1040 = vmatpush.msra.mxu1 %v3773_v55  ;;  %v3831_v55 = vperm.slane %v800_v50, 0 }
  0xcf   : > { %v692_v33 = vadd.f32 %v3204_v24, %v691_v32  ;;  %v740_v22 = vpop.f32.mrf.mxu1  ;;  %v941_v24 = vld [vmem:[#allocation7 + $0x68] sm:$0xff]  ;;  %v970_v32 = vld [vmem:[#allocation7 + $0x150] sm:$0xff] }
  0xd0   : > { %v741_v26 = vadd.f32 %v3756_v34, %v740_v22  ;;  %1089 = vmatpush.msrb.mxu3 %v941_v24  ;;  %3110 = vmatpush.msrb.mxu2 %v970_v32  ;;  %v963_v34 = vld [vmem:[#allocation7 + $0x118] sm:$0xff] }
  0xd1   : > { %2949 = vmatmul.msk.f32.gmra.mxu3 %vm652_vm0, %v692_v33  ;;  %2957 = vmatmul.msk.f32.gmra.mxu0 %vm652_vm0, %v692_v33  ;;  %v937_v33 = vld [vmem:[#allocation7 + $0x48] sm:$0xff]  ;;  %v3848_v22 = vld [vmem:[%s4732_s8] ss:$0 sm:$0xff] }
  0xd2   : > { %1090 = vmatpush.msrb.mxu3 %v939_v29  ;;  %1135 = vmatpush.msra.mxu0 %v963_v34 }
  0xd3   : > { %3111 = vmatpush.msrb.mxu2 %v968_v36  ;;  %1041 = vmatpush.msra.mxu1 %v3776_v59 }
  0xd4   : > { %1091 = vmatpush.msrb.mxu3 %v937_v33  ;;  %1136 = vmatpush.msra.mxu0 %v961_v38 }
  0xd5   : > { %3112 = vmatpush.msrb.mxu2 %v966_v41  ;;  %1042 = vmatpush.msra.mxu1 %v3781_v0 }
  0xd6   : > { %1092 = vmatpush.msrb.mxu3 %v935_v37 }
  0xd7   : > { %1043 = vmatpush.msra.mxu1 %v3786_v5 }
  0xd8   : > { %1093 = vmatpush.msrb.mxu3 %v933_v42 }
  0xd9   : > { %2950 = vmatmul.msk.f32.gmra.mxu3 %vm652_vm0, %v732_v44  ;;  %2958 = vmatmul.msk.f32.gmra.mxu0 %vm652_vm0, %v732_v44  ;;  %v964_v44 = vld [vmem:[#allocation7 + $0x120] sm:$0xff] }
  0xda   : > { %3113 = vmatpush.msrb.mxu2 %v964_v44  ;;  %1094 = vmatpush.msrb.mxu3 %v931_v45 }
  0xdb   : > { %1044 = vmatpush.msra.mxu1 %v3790_v9 }
  0xdc   : > { %3114 = vmatpush.msrb.mxu2 %v962_v47  ;;  %1095 = vmatpush.msrb.mxu3 %v929_v48 }
  0xdd   : > { %1045 = vmatpush.msra.mxu1 %v3794_v14 }
  0xde   : > { %3115 = vmatpush.msrb.mxu2 %v960_v49 }
  0xdf   : > { %1046 = vmatpush.msra.mxu1 %v3797_v17 }
  0xe1   : > { %2951 = vmatmul.msk.f32.gmra.mxu3 %vm652_vm0, %v735_v61  ;;  %2959 = vmatmul.msk.f32.gmra.mxu0 %vm652_vm0, %v735_v61 }
  0xe2   : > { %1047 = vmatpush.msra.mxu1 %v3804_v23  ;;  %v780_v23 = vpop.f32.mrf.mxu2 }
  0xe3   : > { %v781_v24 = vadd.f32 %v3848_v22, %v780_v23 }
  0xe4   : > { %1048 = vmatpush.msra.mxu1 %v972_v28 }
  0xe6   : > { %1049 = vmatpush.msra.mxu1 %v970_v32 }
  0xe8   : > { %1050 = vmatpush.msra.mxu1 %v968_v36 }
  0xe9   : > { %2952 = vmatmul.msk.f32.gmra.mxu3 %vm652_vm0, %v738_v13  ;;  %2960 = vmatmul.msk.f32.gmra.mxu0 %vm652_vm0, %v738_v13 }
  0xea   : > { %1051 = vmatpush.msra.mxu1 %v966_v41  ;;  %v783_v31 = vpop.f32.mrf.mxu2 }
  0xeb   : > { %v784_v32 = vadd.f32 %v3848_v22, %v783_v31 }
  0xec   : > { %1052 = vmatpush.msra.mxu1 %v964_v44 }
  0xed   : > { %1859 = vmatpush.msra.mxu3 %v784_v32 }
  0xee   : > { %1053 = vmatpush.msra.mxu1 %v962_v47 }
  0xf0   : > { %1054 = vmatpush.msra.mxu1 %v960_v49 }
  0xf1   : > { %2953 = vmatmul.msk.f32.gmra.mxu3 %vm652_vm0, %v741_v26  ;;  %2961 = vmatmul.msk.f32.gmra.mxu0 %vm652_vm0, %v741_v26 }
  0xf2   : > { %v3858_v39 = vpop.f32.mrf.mxu2 }
  0xfa   : > { %v789_v40 = vpop.f32.mrf.mxu2 }
  0xfb   : > { %v3861_v41 = vadd.f32 %v3848_v22, %v789_v40 }
  0xfd   : > { %4782 = vst [vmem:[#allocation23_spill] sm:$0xff] %v3861_v41 }
 0x136   : > { %v888_v52 = vpop.f32.mrf.mxu0 }
 0x137   : > { %v3828_v53 = vadd.f32 %v888_v52, %v3825_v51 }
 0x139   : > { %v913_v54 = vmax.f32 %v3828_v53, 0.0 }
 0x13b   : > { %1137 = vmatmul.f32.vlgmr.msra.gmra.mxu0 %v913_v54 }
 0x13c   : > { %v847_v56 = vpop.f32.mrf.mxu3 }
 0x13d   : > { %v848_v57 = vadd.f32 %v847_v56, %v3831_v55 }
 0x13e   : > { %v891_v58 = vpop.f32.mrf.mxu0 }
 0x13f   : > { %v912_v59 = vmax.f32 %v848_v57, 0.0  ;;  %v892_v60 = vadd.f32 %v891_v58, %v3825_v51 }
 0x141   : > { %v915_v61 = vmax.f32 %v892_v60, 0.0  ;;  %1014 = vmatmul.f32.vlgmr.msrb.gmra.mxu1 %v912_v59  ;;  %1096 = vmatmul.f32.vlgmr.msrb.gmra.mxu3 %v912_v59 }
 0x142   : > { %1514 = vmatpush.msrb.mxu1 %v781_v24 }
 0x143   : > { %1058 = vmatmul.f32.vlgmr.msrb.gmra.mxu2 %v915_v61  ;;  %1140 = vmatmul.f32.gmra.mxu0 %v915_v61  ;;  %v992_v61 = vld [vmem:[%s4736_s12] sm:$0x3] }
 0x144   : > { %v850_v62 = vpop.f32.mrf.mxu3 }
 0x145   : > { %v851_v63 = vadd.f32 %v850_v62, %v3831_v55 }
 0x146   : > { %v894_v0 = vpop.f32.mrf.mxu0 }
 0x147   : > { %v895_v1 = vadd.f32 %v894_v0, %v3825_v51  ;;  %v914_v2 = vmax.f32 %v851_v63, 0.0  ;;  %v3897_v0 = vperm.slane %v992_v61, 0 }
 0x149   : > { %1017 = vmatmul.f32.gmra.mxu1 %v914_v2  ;;  %1099 = vmatmul.f32.gmra.mxu3 %v914_v2  ;;  %v917_v3 = vmax.f32 %v895_v1, 0.0 }
 0x14b   : > { %1061 = vmatmul.f32.gmra.mxu2 %v917_v3  ;;  %1143 = vmatmul.f32.gmra.mxu0 %v917_v3 }
 0x14c   : > { %v853_v4 = vpop.f32.mrf.mxu3 }
 0x14d   : > { %v854_v5 = vadd.f32 %v853_v4, %v3831_v55 }
 0x14e   : > { %v897_v6 = vpop.f32.mrf.mxu0 }
 0x14f   : > { %v898_v7 = vadd.f32 %v897_v6, %v3825_v51  ;;  %v916_v8 = vmax.f32 %v854_v5, 0.0  ;;  %v3900_v5 = vperm.slane %v992_v61, 1 }
 0x151   : > { %1020 = vmatmul.f32.gmra.mxu1 %v916_v8  ;;  %1102 = vmatmul.f32.gmra.mxu3 %v916_v8  ;;  %v919_v9 = vmax.f32 %v898_v7, 0.0  ;;  %4789 = vst [vmem:[#allocation30_spill] sm:$0xff] %v3900_v5 }
 0x153   : > { %1064 = vmatmul.f32.gmra.mxu2 %v919_v9  ;;  %1146 = vmatmul.f32.gmra.mxu0 %v919_v9 }
 0x154   : > { %v856_v10 = vpop.f32.mrf.mxu3 }
 0x155   : > { %v857_v11 = vadd.f32 %v856_v10, %v3831_v55 }
 0x156   : > { %v900_v12 = vpop.f32.mrf.mxu0 }
 0x157   : > { %v901_v13 = vadd.f32 %v900_v12, %v3825_v51  ;;  %v918_v14 = vmax.f32 %v857_v11, 0.0 }
 0x159   : > { %1023 = vmatmul.f32.gmra.mxu1 %v918_v14  ;;  %1105 = vmatmul.f32.gmra.mxu3 %v918_v14  ;;  %v921_v15 = vmax.f32 %v901_v13, 0.0 }
 0x15b   : > { %1067 = vmatmul.f32.gmra.mxu2 %v921_v15  ;;  %1149 = vmatmul.f32.gmra.mxu0 %v921_v15 }
 0x15c   : > { %v859_v16 = vpop.f32.mrf.mxu3 }
 0x15d   : > { %v860_v17 = vadd.f32 %v859_v16, %v3831_v55 }
 0x15e   : > { %v903_v18 = vpop.f32.mrf.mxu0 }
 0x15f   : > { %v904_v19 = vadd.f32 %v903_v18, %v3825_v51  ;;  %v920_v20 = vmax.f32 %v860_v17, 0.0 }
 0x161   : > { %1026 = vmatmul.f32.gmra.mxu1 %v920_v20  ;;  %1108 = vmatmul.f32.gmra.mxu3 %v920_v20  ;;  %v923_v21 = vmax.f32 %v904_v19, 0.0 }
 0x163   : > { %1070 = vmatmul.f32.gmra.mxu2 %v923_v21  ;;  %1152 = vmatmul.f32.gmra.mxu0 %v923_v21 }
 0x164   : > { %v862_v25 = vpop.f32.mrf.mxu3 }
 0x165   : > { %v863_v26 = vadd.f32 %v862_v25, %v3831_v55 }
 0x166   : > { %v906_v27 = vpop.f32.mrf.mxu0 }
 0x167   : > { %v907_v28 = vadd.f32 %v906_v27, %v3825_v51  ;;  %v922_v29 = vmax.f32 %v863_v26, 0.0 }
 0x169   : > { %1029 = vmatmul.f32.gmra.mxu1 %v922_v29  ;;  %1111 = vmatmul.f32.gmra.mxu3 %v922_v29  ;;  %v925_v30 = vmax.f32 %v907_v28, 0.0 }
 0x16b   : > { %1073 = vmatmul.f32.gmra.mxu2 %v925_v30  ;;  %1155 = vmatmul.f32.gmra.mxu0 %v925_v30 }
 0x16c   : > { %v865_v33 = vpop.f32.mrf.mxu3 }
 0x16d   : > { %v866_v34 = vadd.f32 %v865_v33, %v3831_v55 }
 0x16e   : > { %v909_v42 = vpop.f32.mrf.mxu0 }
 0x16f   : > { %v924_v35 = vmax.f32 %v866_v34, 0.0  ;;  %v910_v20 = vadd.f32 %v909_v42, %v3825_v51 }
 0x171   : > { %1032 = vmatmul.f32.gmra.mxu1 %v924_v35  ;;  %1114 = vmatmul.f32.gmra.mxu3 %v924_v35  ;;  %v927_v27 = vmax.f32 %v910_v20, 0.0 }
 0x173   : > { %1076 = vmatmul.f32.gmra.mxu2 %v927_v27  ;;  %1158 = vmatmul.f32.gmra.mxu0 %v927_v27 }
 0x174   : > { %v868_v36 = vpop.f32.mrf.mxu3 }
 0x175   : > { %v869_v37 = vadd.f32 %v868_v36, %v3831_v55 }
 0x177   : > { %v926_v38 = vmax.f32 %v869_v37, 0.0 }
 0x179   : > { %1035 = vmatmul.f32.gmra.mxu1 %v926_v38  ;;  %1117 = vmatmul.f32.gmra.mxu3 %v926_v38 }
 0x181   : > { %1055 = vmatmul.f32.vlgmr.msra.gmra.mxu1 %v913_v54 }
 0x182   : > { %2549 = vmatpush.msra.mxu1 %v3861_v41  ;;  %v4116_v41 = vld [vmem:[%s4737_s13] sm:$0xff] }
 0x183   : > { %4797 = vst [vmem:[#allocation38_spill] sm:$0xff] %v4116_v41 }
 0x1b8   : > { %v3864_v43 = vpop.f32.mrf.mxu0 }
 0x1be   : > { %v3866_v44 = vpop.f32.mrf.mxu1 }
 0x1c0   : > { %v3870_v46 = vpop.f32.mrf.mxu0 }
 0x1c4   : > { %v3868_v45 = vpop.f32.mrf.mxu3 }
 0x1c6   : > { %v3872_v47 = vpop.f32.mrf.mxu1  ;;  %v3874_v48 = vpop.f32.mrf.mxu2 }
 0x1c8   : > { %v3882_v53 = vpop.f32.mrf.mxu0 }
 0x1c9   : > { %4783 = vst [vmem:[#allocation24_spill] sm:$0xff] %v3882_v53  ;;  %v787_v53 = vadd.f32 %v3848_v22, %v3858_v39 }
 0x1cc   : > { %v3876_v49 = vpop.f32.mrf.mxu3 }
 0x1ce   : > { %v3878_v50 = vpop.f32.mrf.mxu1  ;;  %v3880_v52 = vpop.f32.mrf.mxu2 }
 0x1d0   : > { %v3890_v57 = vpop.f32.mrf.mxu0 }
 0x1d1   : > { %4787 = vst [vmem:[#allocation28_spill] sm:$0xff] %v3890_v57 }
 0x1d4   : > { %v3884_v54 = vpop.f32.mrf.mxu3 }
 0x1d5   : > { %4784 = vst [vmem:[#allocation25_spill] sm:$0xff] %v3884_v54 }
 0x1d6   : > { %v3886_v55 = vpop.f32.mrf.mxu1  ;;  %v3888_v56 = vpop.f32.mrf.mxu2 }
 0x1d7   : > { %4785 = vst [vmem:[#allocation26_spill] sm:$0xff] %v3886_v55  ;;  %v4068_v55 = vld [vmem:[%s4737_s13 + $0x30] sm:$0xff] }
 0x1d8   : > { %4786 = vst [vmem:[#allocation27_spill] sm:$0xff] %v3888_v56  ;;  %v1150_v62 = vpop.f32.mrf.mxu0 }
 0x1d9   : > { %4791 = vst [vmem:[#allocation32_spill] sm:$0xff] %v4068_v55 }
 0x1dc   : > { %v3892_v58 = vpop.f32.mrf.mxu3 }
 0x1dd   : > { %4788 = vst [vmem:[#allocation29_spill] sm:$0xff] %v3892_v58  ;;  %v4025_v58 = vld [vmem:[%s4737_s13 + $0x60] sm:$0xff] }
 0x1de   : > { %v1027_v59 = vpop.f32.mrf.mxu1  ;;  %v1068_v60 = vpop.f32.mrf.mxu2 }
 0x1e0   : > { %v1153_v8 = vpop.f32.mrf.mxu0 }
 0x1e4   : > { %v1109_v63 = vpop.f32.mrf.mxu3 }
 0x1e6   : > { %v1030_v1 = vpop.f32.mrf.mxu1  ;;  %v1071_v2 = vpop.f32.mrf.mxu2 }
 0x1e7   : > { %v1031_v3 = vadd.f32 %v1030_v1, %v3897_v0 }
 0x1e9   : > { %v1072_v4 = vadd.f32 %v1071_v2, %v1031_v3  ;;  %v1028_v2 = vadd.f32 %v1027_v59, %v3897_v0 }
 0x1eb   : > { %v1188_v6 = vand.u32 2147483647, %v1072_v4  ;;  %v1172_v33 = vmax.f32 %v1072_v4, 0.0  ;;  %v1069_v3 = vadd.f32 %v1068_v60, %v1028_v2  ;;  %v1110_v4 = vadd.f32 %v1109_v63, %v3900_v5 }
 0x1ec   : > { %v1112_v7 = vpop.f32.mrf.mxu3 }
 0x1ed   : > { %v1204_v9 = vsub.f32 0.0, %v1188_v6  ;;  %v1113_v10 = vadd.f32 %v1112_v7, %v3900_v5  ;;  %v1186_v6 = vand.u32 2147483647, %v1069_v3 }
 0x1ee   : > { %v1033_v11 = vpop.f32.mrf.mxu1  ;;  %v1074_v12 = vpop.f32.mrf.mxu2 }
 0x1ef   : > { %v1230_v13 = vmul.f32 1.442695, %v1204_v9  ;;  %v1154_v14 = vadd.f32 %v1153_v8, %v1113_v10  ;;  %v1034_v15 = vadd.f32 %v1033_v11, %v3897_v0  ;;  %v1202_v7 = vsub.f32 0.0, %v1186_v6 }
 0x1f0   : > { %v1151_v8 = vadd.f32 %v1150_v62, %v1110_v4 }
 0x1f1   : > { %3208 = vpow2.f32 %v1230_v13  ;;  %v1189_v16 = vand.u32 2147483647, %v1154_v14  ;;  %v1075_v17 = vadd.f32 %v1074_v12, %v1034_v15  ;;  %v1173_v36 = vmax.f32 %v1154_v14, 0.0  ;;  %v1156_v14 = vpop.f32.mrf.mxu0 }
 0x1f2   : > { %v1226_v9 = vmul.f32 1.442695, %v1202_v7  ;;  %v1187_v10 = vand.u32 2147483647, %v1151_v8 }
 0x1f3   : > { %v1205_v18 = vsub.f32 0.0, %v1189_v16  ;;  %v1190_v19 = vand.u32 2147483647, %v1075_v17  ;;  %v1174_v38 = vmax.f32 %v1075_v17, 0.0 }
 0x1f4   : > { %v1203_v11 = vsub.f32 0.0, %v1187_v10  ;;  %v1115_v13 = vpop.f32.mrf.mxu3 }
 0x1f5   : > { %v1206_v21 = vsub.f32 0.0, %v1190_v19  ;;  %v1232_v23 = vmul.f32 1.442695, %v1205_v18  ;;  %v1116_v15 = vadd.f32 %v1115_v13, %v3900_v5 }
 0x1f6   : > { %v1228_v12 = vmul.f32 1.442695, %v1203_v11 }
 0x1f7   : > { %v3209_v24 = vpop.eup %3208  ;;  %v1234_v25 = vmul.f32 1.442695, %v1206_v21  ;;  %3210 = vpow2.f32 %v1232_v23  ;;  %v1157_v17 = vadd.f32 %v1156_v14, %v1116_v15 }
 0x1f8   : > { %v1252_v26 = vadd.f32 1.0, %v3209_v24  ;;  %v1170_v24 = vmax.f32 %v1069_v3, 0.0 }
 0x1f9   : > { %3212 = vpow2.f32 %v1234_v25  ;;  %v1191_v59 = vand.u32 2147483647, %v1157_v17 }
 0x1fa   : > { %3214 = vlog2.f32 %v1252_v26 }
 0x1fb   : > { %v1207_v60 = vsub.f32 0.0, %v1191_v59 }
 0x1fc   : > { %v1118_v6 = vpop.f32.mrf.mxu3 }
 0x1fd   : > { %v3211_v28 = vpop.eup %3210  ;;  %v1236_v63 = vmul.f32 1.442695, %v1207_v60  ;;  %v1119_v4 = vadd.f32 %v1118_v6, %v3900_v5 }
 0x1fe   : > { %v1253_v29 = vadd.f32 1.0, %v3211_v28 }
 0x1ff   : > { %v3213_v30 = vpop.eup %3212 }
 0x200   : > { %v3215_v31 = vpop.eup %3214  ;;  %3216 = vlog2.f32 %v1253_v29  ;;  %v1254_v32 = vadd.f32 1.0, %v3213_v30  ;;  %v1171_v29 = vmax.f32 %v1151_v8, 0.0  ;;  %v1159_v8 = vpop.f32.mrf.mxu0 }
 0x201   : > { %v1279_v34 = vmul.f32 0.6931472, %v3215_v31  ;;  %v1175_v31 = vmax.f32 %v1157_v17, 0.0 }
 0x202   : > { %3218 = vlog2.f32 %v1254_v32 }
 0x203   : > { %v1300_v51 = vadd.f32 %v1279_v34, %v1172_v33  ;;  %3220 = vpow2.f32 %v1226_v9  ;;  %v1160_v9 = vadd.f32 %v1159_v8, %v1119_v4 }
 0x204   : > { %3222 = vpow2.f32 %v1228_v12 }
 0x205   : > { %1684 = vxpose.xlu0.b32.start.end [1/1] (short) %v1300_v51, 128  ;;  %v1193_v12 = vand.u32 2147483647, %v1160_v9 }
 0x206   : > { %v3217_v35 = vpop.eup %3216 }
 0x207   : > { %v1281_v37 = vmul.f32 0.6931472, %v3217_v35  ;;  %v1209_v14 = vsub.f32 0.0, %v1193_v12 }
 0x208   : > { %v3219_v40 = vpop.eup %3218 }
 0x209   : > { %v1301_v42 = vadd.f32 %v1281_v37, %v1173_v36  ;;  %v1283_v61 = vmul.f32 0.6931472, %v3219_v40  ;;  %v3221_v16 = vpop.eup %3220 }
 0x20a   : > { %v1250_v18 = vadd.f32 1.0, %v3221_v16  ;;  %v3223_v19 = vpop.eup %3222  ;;  %v1240_v16 = vmul.f32 1.442695, %v1209_v14 }
 0x20b   : > { %1716 = vxpose.xlu2.b32.start.end [1/1] (short) %v1301_v42, 128  ;;  %v1302_v1 = vadd.f32 %v1283_v61, %v1174_v38  ;;  %v1251_v20 = vadd.f32 1.0, %v3223_v19  ;;  %v1036_v42 = vpop.f32.mrf.mxu1 }
 0x20c   : > { %3224 = vlog2.f32 %v1250_v18  ;;  %v1037_v61 = vadd.f32 %v1036_v42, %v3897_v0 }
 0x20d   : > { %2029 = vxpose.xlu1.b32.start.end [1/1] (short) %v1302_v1, 128  ;;  %3226 = vpow2.f32 %v1236_v63  ;;  %v1077_v1 = vpop.f32.mrf.mxu2 }
 0x20e   : > { %3228 = vlog2.f32 %v1251_v20  ;;  %v1078_v2 = vadd.f32 %v1077_v1, %v1037_v61 }
 0x210   : > { %v1192_v7 = vand.u32 2147483647, %v1078_v2 }
 0x212   : > { %v3225_v62 = vpop.eup %3224  ;;  %v1208_v10 = vsub.f32 0.0, %v1192_v7 }
 0x213   : > { %v1275_v21 = vmul.f32 0.6931472, %v3225_v62  ;;  %v3227_v23 = vpop.eup %3226  ;;  %v1176_v62 = vmax.f32 %v1078_v2, 0.0 }
 0x214   : > { %v3229_v26 = vpop.eup %3228  ;;  %v1255_v27 = vadd.f32 1.0, %v3227_v23  ;;  %v1238_v13 = vmul.f32 1.442695, %v1208_v10 }
 0x215   : > { %v1298_v25 = vadd.f32 %v1275_v21, %v1170_v24  ;;  %v1277_v28 = vmul.f32 0.6931472, %v3229_v26 }
 0x216   : > { %3230 = vlog2.f32 %v1255_v27  ;;  %v1177_v27 = vmax.f32 %v1160_v9, 0.0 }
 0x217   : > { %v1299_v30 = vadd.f32 %v1277_v28, %v1171_v29  ;;  %3232 = vpow2.f32 %v1238_v13 }
 0x218   : > { %3234 = vpow2.f32 %v1240_v16 }
 0x21c   : > { %v3231_v32 = vpop.eup %3230 }
 0x21d   : > { %v1285_v33 = vmul.f32 0.6931472, %v3231_v32  ;;  %v3233_v17 = vpop.eup %3232 }
 0x21e   : > { %v1256_v59 = vadd.f32 1.0, %v3233_v17  ;;  %v3235_v60 = vpop.eup %3234 }
 0x21f   : > { %v1303_v34 = vadd.f32 %v1285_v33, %v1175_v31  ;;  %v1257_v63 = vadd.f32 1.0, %v3235_v60 }
 0x220   : > { %3236 = vlog2.f32 %v1256_v59 }
 0x221   : > { %3238 = vlog2.f32 %v1257_v63 }
 0x226   : > { %v3237_v20 = vpop.eup %3236 }
 0x227   : > { %v1287_v21 = vmul.f32 0.6931472, %v3237_v20 }
 0x229   : > { %v1304_v24 = vadd.f32 %v1287_v21, %v1176_v62 }
 0x285   : > { %1338 = vxpose.xlu0.b32.start.end [1/1] (short) %v1298_v25, 128  ;;  %v3239_v25 = vpop.eup %3238 }
 0x286   : > { %v1289_v28 = vmul.f32 0.6931472, %v3239_v25 }
 0x28b   : > { %2061 = vxpose.xlu2.b32.start.end [1/1] (short) %v1303_v34, 128 }
 0x28d   : > { %1370 = vxpose.xlu1.b32.start.end [1/1] (short) %v1299_v30, 128  ;;  %v1305_v30 = vadd.f32 %v1289_v28, %v1177_v27 }
 0x2a9   : > { %v1700_v51 = vpop.trf.xlu0 }
 0x2aa   : > { %2994 = vmatmul.msk.f32.vlgmr.msra.gmra.mxu3 %vm1402_vm1, %v1700_v51 }
 0x2b1   : > { %v1701_v35 = vpop.trf.xlu0  ;;  %v3922_v26 = vpop.trf.xlu1 }
 0x2b2   : > { %2995 = vmatmul.msk.f32.gmra.mxu3 %vm1402_vm1, %v1701_v35 }
 0x2b9   : > { %v1702_v36 = vpop.trf.xlu0  ;;  %v3925_v31 = vpop.trf.xlu1 }
 0x2ba   : > { %2996 = vmatmul.msk.f32.gmra.mxu3 %vm1402_vm1, %v1702_v36 }
 0x2c1   : > { %v1703_v37 = vpop.trf.xlu0  ;;  %v3928_v33 = vpop.trf.xlu1 }
 0x2c2   : > { %2997 = vmatmul.msk.f32.gmra.mxu3 %vm1402_vm1, %v1703_v37 }
 0x2c9   : > { %v1704_v38 = vpop.trf.xlu0  ;;  %v3931_v51 = vpop.trf.xlu1 }
 0x2ca   : > { %2998 = vmatmul.msk.f32.gmra.mxu3 %vm1402_vm1, %v1704_v38 }
 0x2d1   : > { %v1705_v40 = vpop.trf.xlu0  ;;  %v3934_v36 = vpop.trf.xlu1 }
 0x2d2   : > { %2999 = vmatmul.msk.f32.gmra.mxu3 %vm1402_vm1, %v1705_v40 }
 0x2d9   : > { %v1706_v3 = vpop.trf.xlu0  ;;  %v3939_v40 = vpop.trf.xlu1 }
 0x2da   : > { %3000 = vmatmul.msk.f32.gmra.mxu3 %vm1402_vm1, %v1706_v3 }
 0x2e1   : > { %v1707_v11 = vpop.trf.xlu0  ;;  %v3944_v1 = vpop.trf.xlu1 }
 0x2e2   : > { %3001 = vmatmul.msk.f32.gmra.mxu3 %vm1402_vm1, %v1707_v11 }
 0x2e9   : > { %v1708_v15 = vpop.trf.xlu0  ;;  %v3949_v6 = vpop.trf.xlu1 }
 0x2ea   : > { %3002 = vmatmul.msk.f32.gmra.mxu3 %vm1402_vm1, %v1708_v15 }
 0x2f1   : > { %v1709_v18 = vpop.trf.xlu0  ;;  %v3954_v8 = vpop.trf.xlu1 }
 0x2f2   : > { %3003 = vmatmul.msk.f32.gmra.mxu3 %vm1402_vm1, %v1709_v18 }
 0x2f9   : > { %v1710_v19 = vpop.trf.xlu0  ;;  %v3959_v11 = vpop.trf.xlu1 }
 0x2fa   : > { %3004 = vmatmul.msk.f32.gmra.mxu3 %vm1402_vm1, %v1710_v19 }
 0x301   : > { %v1711_v23 = vpop.trf.xlu0  ;;  %v3964_v14 = vpop.trf.xlu1 }
 0x302   : > { %3005 = vmatmul.msk.f32.gmra.mxu3 %vm1402_vm1, %v1711_v23 }
 0x305   : > { %2374 = vxpose.xlu0.b32.start.end [1/1] (short) %v1304_v24, 128 }
 0x309   : > { %v1712_v29 = vpop.trf.xlu0  ;;  %v3969_v17 = vpop.trf.xlu1 }
 0x30a   : > { %3006 = vmatmul.msk.f32.gmra.mxu3 %vm1402_vm1, %v1712_v29 }
 0x30d   : > { %2406 = vxpose.xlu1.b32.start.end [1/1] (short) %v1305_v30, 128 }
 0x311   : > { %v1713_v32 = vpop.trf.xlu0  ;;  %v3974_v60 = vpop.trf.xlu1 }
 0x312   : > { %3007 = vmatmul.msk.f32.gmra.mxu3 %vm1402_vm1, %v1713_v32 }
 0x319   : > { %v1714_v34 = vpop.trf.xlu0  ;;  %v3979_v20 = vpop.trf.xlu1 }
 0x31a   : > { %3008 = vmatmul.msk.f32.gmra.mxu3 %vm1402_vm1, %v1714_v34 }
 0x321   : > { %v1715_v35 = vpop.trf.xlu0  ;;  %v3982_v23 = vpop.trf.xlu1 }
 0x322   : > { %3009 = vmatmul.msk.f32.gmra.mxu3 %vm1402_vm1, %v1715_v35 }
 0x329   : > { %v1354_v37 = vpop.trf.xlu0  ;;  %v3985_v27 = vpop.trf.xlu1 }
 0x32a   : > { %2962 = vmatmul.msk.f32.vlgmr.msrb.gmra.mxu1 %vm1402_vm1, %v1354_v37 }
 0x32d   : > { %v3937_v38 = vpop.f32.mrf.mxu3 }
 0x331   : > { %v1355_v42 = vpop.trf.xlu0  ;;  %v1386_v32 = vpop.trf.xlu1 }
 0x332   : > { %2963 = vmatmul.msk.f32.gmra.mxu1 %vm1402_vm1, %v1355_v42 }
 0x335   : > { %v3942_v61 = vpop.f32.mrf.mxu3 }
 0x339   : > { %v1356_v2 = vpop.trf.xlu0  ;;  %v1387_v37 = vpop.trf.xlu1 }
 0x33a   : > { %2964 = vmatmul.msk.f32.gmra.mxu1 %vm1402_vm1, %v1356_v2  ;;  %v1019_v2 = vadd.f32 %v3872_v47, %v3897_v0  ;;  %v4004_v47 = vld [vmem:[%s4737_s13 + $0x78] sm:$0xff] }
 0x33d   : > { %v3947_v3 = vpop.f32.mrf.mxu3 }
 0x341   : > { %v1357_v4 = vpop.trf.xlu0 }
 0x342   : > { %2965 = vmatmul.msk.f32.gmra.mxu1 %vm1402_vm1, %v1357_v4 }
 0x345   : > { %v3952_v7 = vpop.f32.mrf.mxu3 }
 0x349   : > { %v1358_v9 = vpop.trf.xlu0 }
 0x34a   : > { %2966 = vmatmul.msk.f32.gmra.mxu1 %vm1402_vm1, %v1358_v9  ;;  %v3994_v9 = vadd.f32 %v3874_v48, %v1019_v2  ;;  %v4009_v48 = vld [vmem:[%s4737_s13 + $0x70] sm:$0xff] }
 0x34d   : > { %v3957_v10 = vpop.f32.mrf.mxu3 }
 0x351   : > { %v1359_v12 = vpop.trf.xlu0 }
 0x352   : > { %2967 = vmatmul.msk.f32.gmra.mxu1 %vm1402_vm1, %v1359_v12 }
 0x355   : > { %v3962_v13 = vpop.f32.mrf.mxu3 }
 0x359   : > { %v1360_v15 = vpop.trf.xlu0 }
 0x35a   : > { %2968 = vmatmul.msk.f32.gmra.mxu1 %vm1402_vm1, %v1360_v15  ;;  %v1388_v15 = vpop.trf.xlu1 }
 0x35d   : > { %v3967_v16 = vpop.f32.mrf.mxu3 }
 0x361   : > { %v1361_v18 = vpop.trf.xlu0 }
 0x362   : > { %2969 = vmatmul.msk.f32.gmra.mxu1 %vm1402_vm1, %v1361_v18  ;;  %v1180_v18 = vand.u32 2147483647, %v3994_v9 }
 0x365   : > { %v3972_v59 = vpop.f32.mrf.mxu3 }
 0x369   : > { %v1362_v19 = vpop.trf.xlu0 }
 0x36a   : > { %2970 = vmatmul.msk.f32.gmra.mxu1 %vm1402_vm1, %v1362_v19  ;;  %v3997_v19 = vpop.f32.mrf.mxu1 }
 0x36d   : > { %v3977_v63 = vpop.f32.mrf.mxu3 }
 0x371   : > { %v1363_v62 = vpop.trf.xlu0 }
 0x372   : > { %2971 = vmatmul.msk.f32.gmra.mxu1 %vm1402_vm1, %v1363_v62  ;;  %v1732_v62 = vpop.trf.xlu2 }
 0x373   : > { %3010 = vmatmul.msk.f32.gmra.mxu3 %vm1402_vm1, %v1732_v62  ;;  %v4019_v62 = vpop.trf.xlu1 }
 0x375   : > { %v1888_v21 = vpop.f32.mrf.mxu3 }
 0x379   : > { %v1364_v24 = vpop.trf.xlu0 }
 0x37a   : > { %2972 = vmatmul.msk.f32.gmra.mxu1 %vm1402_vm1, %v1364_v24  ;;  %v1733_v57 = vpop.trf.xlu2 }
 0x37b   : > { %3011 = vmatmul.msk.f32.gmra.mxu3 %vm1402_vm1, %v1733_v57  ;;  %v1390_v56 = vpop.trf.xlu1 }
 0x37d   : > { %v1891_v25 = vpop.f32.mrf.mxu3 }
 0x381   : > { %v1365_v28 = vpop.trf.xlu0 }
 0x382   : > { %2973 = vmatmul.msk.f32.gmra.mxu1 %vm1402_vm1, %v1365_v28  ;;  %v1196_v28 = vsub.f32 0.0, %v1180_v18 }
 0x384   : > { %v1214_v2 = vmul.f32 1.442695, %v1196_v28 }
 0x385   : > { %v1894_v29 = vpop.f32.mrf.mxu3 }
 0x386   : > { %3240 = vpow2.f32 %v1214_v2 }
 0x389   : > { %v1366_v30 = vpop.trf.xlu0 }
 0x38a   : > { %2974 = vmatmul.msk.f32.gmra.mxu1 %vm1402_vm1, %v1366_v30 }
 0x38d   : > { %v1897_v34 = vpop.f32.mrf.mxu3 }
 0x391   : > { %v1367_v35 = vpop.trf.xlu0 }
 0x392   : > { %2975 = vmatmul.msk.f32.gmra.mxu1 %vm1402_vm1, %v1367_v35 }
 0x395   : > { %v1900_v42 = vpop.f32.mrf.mxu3 }
 0x399   : > { %v1368_v4 = vpop.trf.xlu0 }
 0x39a   : > { %2976 = vmatmul.msk.f32.gmra.mxu1 %vm1402_vm1, %v1368_v4  ;;  %v4015_v4 = vld [vmem:[%s4737_s13 + $0x68] sm:$0xff] }
 0x39b   : > { %v1970_v28 = vmul.f32 %v1900_v42, %v4015_v4 }
 0x39d   : > { %v1903_v12 = vpop.f32.mrf.mxu3 }
 0x3a1   : > { %v1369_v24 = vpop.trf.xlu0 }
 0x3a2   : > { %2977 = vmatmul.msk.f32.gmra.mxu1 %vm1402_vm1, %v1369_v24  ;;  %v1971_v24 = vmul.f32 %v1903_v12, %v4009_v48  ;;  %v1969_v12 = vmul.f32 %v1897_v34, %v4025_v58  ;;  %v1734_v34 = vpop.trf.xlu2 }
 0x3a3   : > { %3012 = vmatmul.msk.f32.gmra.mxu3 %vm1402_vm1, %v1734_v34 }
 0x3a5   : > { %v1906_v30 = vpop.f32.mrf.mxu3 }
 0x3a6   : > { %v1972_v35 = vmul.f32 %v1906_v30, %v4004_v47  ;;  %v4033_v30 = vld [vmem:[%s4737_s13 + $0x58] sm:$0xff] }
 0x3a7   : > { %v4017_v18 = vpop.f32.mrf.mxu1  ;;  %v1968_v57 = vmul.f32 %v1894_v29, %v4033_v30 }
 0x3a8   : > { %1989 = vmatpush.msrb.mxu0 %v1972_v35  ;;  %v4039_v35 = vld [vmem:[%s4737_s13 + $0x50] sm:$0xff] }
 0x3a9   : > { %v1967_v2 = vmul.f32 %v1891_v25, %v4039_v35  ;;  %v4061_v25 = vld [vmem:[%s4737_s13 + $0x38] sm:$0xff] }
 0x3aa   : > { %2978 = vmatmul.msk.f32.gmra.mxu1 %vm1402_vm1, %v1386_v32  ;;  %1990 = vmatpush.msrb.mxu0 %v1971_v24  ;;  %v4045_v32 = vld [vmem:[%s4737_s13 + $0x48] sm:$0xff]  ;;  %v3241_v24 = vpop.eup %3240  ;;  %4790 = vst [vmem:[#allocation31_spill] sm:$0xff] %v4061_v25  ;;  %v1735_v34 = vpop.trf.xlu2 }
 0x3ab   : > { %v1966_v29 = vmul.f32 %v1888_v21, %v4045_v32  ;;  %v1964_v21 = vmul.f32 %v3972_v59, %v4061_v25  ;;  %3013 = vmatmul.msk.f32.gmra.mxu3 %vm1402_vm1, %v1735_v34 }
 0x3ac   : > { %1991 = vmatpush.msrb.mxu0 %v1970_v28  ;;  %v4053_v28 = vld [vmem:[%s4737_s13 + $0x40] sm:$0xff] }
 0x3ae   : > { %1992 = vmatpush.msrb.mxu0 %v1969_v12  ;;  %v1244_v12 = vadd.f32 1.0, %v3241_v24  ;;  %v4084_v24 = vld [vmem:[%s4737_s13 + $0x20] sm:$0xff] }
 0x3af   : > { %v4047_v42 = vpop.f32.mrf.mxu1  ;;  %4793 = vst [vmem:[#allocation34_spill] sm:$0xff] %v4084_v24 }
 0x3b0   : > { %1993 = vmatpush.msrb.mxu0 %v1968_v57  ;;  %v1965_v57 = vmul.f32 %v3977_v63, %v4053_v28  ;;  %3242 = vlog2.f32 %v1244_v12  ;;  %v1963_v63 = vmul.f32 %v3967_v16, %v4068_v55  ;;  %v1391_v16 = vpop.trf.xlu1  ;;  %v1961_v12 = vmul.f32 %v3957_v10, %v4084_v24 }
 0x3b2   : > { %2979 = vmatmul.msk.f32.gmra.mxu1 %vm1402_vm1, %v1387_v37  ;;  %1994 = vmatpush.msrb.mxu0 %v1967_v2  ;;  %v4075_v37 = vld [vmem:[%s4737_s13 + $0x28] sm:$0xff]  ;;  %v1736_v34 = vpop.trf.xlu2 }
 0x3b3   : > { %4792 = vst [vmem:[#allocation33_spill] sm:$0xff] %v4075_v37  ;;  %v1962_v59 = vmul.f32 %v3962_v13, %v4075_v37  ;;  %3014 = vmatmul.msk.f32.gmra.mxu3 %vm1402_vm1, %v1736_v34 }
 0x3b4   : > { %1995 = vmatpush.msrb.mxu0 %v1966_v29  ;;  %v4093_v29 = vld [vmem:[%s4737_s13 + $0x18] sm:$0xff] }
 0x3b5   : > { %4794 = vst [vmem:[#allocation35_spill] sm:$0xff] %v4093_v29  ;;  %v1960_v13 = vmul.f32 %v3952_v7, %v4093_v29 }
 0x3b6   : > { %1996 = vmatpush.msrb.mxu0 %v1965_v57  ;;  %v4100_v57 = vld [vmem:[%s4737_s13 + $0x10] sm:$0xff] }
 0x3b7   : > { %v4077_v2 = vpop.f32.mrf.mxu1  ;;  %4795 = vst [vmem:[#allocation36_spill] sm:$0xff] %v4100_v57  ;;  %v1959_v10 = vmul.f32 %v3947_v3, %v4100_v57  ;;  %v1957_v3 = vmul.f32 %v3937_v38, %v4116_v41 }
 0x3b8   : > { %1997 = vmatpush.msrb.mxu0 %v1964_v21  ;;  %v3243_v21 = vpop.eup %3242 }
 0x3ba   : > { %2980 = vmatmul.msk.f32.gmra.mxu1 %vm1402_vm1, %v1388_v15  ;;  %1998 = vmatpush.msrb.mxu0 %v1963_v63  ;;  %v4107_v15 = vld [vmem:[%s4737_s13 + $0x8] sm:$0xff] }
 0x3bb   : > { %4796 = vst [vmem:[#allocation37_spill] sm:$0xff] %v4107_v15  ;;  %v1958_v7 = vmul.f32 %v3942_v61, %v4107_v15  ;;  %v1737_v61 = vpop.trf.xlu2 }
 0x3bc   : > { %1999 = vmatpush.msrb.mxu0 %v1962_v59  ;;  %v1263_v59 = vmul.f32 0.6931472, %v3243_v21  ;;  %3015 = vmatmul.msk.f32.gmra.mxu3 %vm1402_vm1, %v1737_v61 }
 0x3be   : > { %2000 = vmatpush.msrb.mxu0 %v1961_v12  ;;  %v1164_v12 = vmax.f32 %v3994_v9, 0.0 }
 0x3bf   : > { %v4109_v63 = vpop.f32.mrf.mxu1 }
 0x3c0   : > { %2001 = vmatpush.msrb.mxu0 %v1960_v13  ;;  %v1292_v21 = vadd.f32 %v1263_v59, %v1164_v12  ;;  %v1392_v13 = vpop.trf.xlu1 }
 0x3c2   : > { %2981 = vmatmul.msk.f32.gmra.mxu1 %vm1402_vm1, %v4019_v62  ;;  %2002 = vmatpush.msrb.mxu0 %v1959_v10 }
 0x3c3   : > { %v1738_v62 = vpop.trf.xlu2 }
 0x3c4   : > { %2003 = vmatpush.msrb.mxu0 %v1958_v7  ;;  %3016 = vmatmul.msk.f32.gmra.mxu3 %vm1402_vm1, %v1738_v62 }
 0x3c6   : > { %2004 = vmatpush.msrb.mxu0 %v1957_v3 }
 0x3c7   : > { %v4128_v34 = vpop.f32.mrf.mxu1  ;;  %2005 = vmatmul.f32.vlgmr.msrb.gmra.mxu0 %v1292_v21 }
 0x3c8   : > { %2204 = vmatpush.msra.mxu0 %v787_v53  ;;  %v1393_v38 = vpop.trf.xlu1 }
 0x3ca   : > { %2982 = vmatmul.msk.f32.gmra.mxu1 %vm1402_vm1, %v1390_v56 }
 0x3cb   : > { %v1739_v39 = vpop.trf.xlu2 }
 0x3cc   : > { %3017 = vmatmul.msk.f32.gmra.mxu3 %vm1402_vm1, %v1739_v39  ;;  %v1016_v39 = vadd.f32 %v3866_v44, %v3897_v0 }
 0x3cf   : > { %v4132_v9 = vpop.f32.mrf.mxu1  ;;  %3026 = vmatmul.msk.f32.vlgmr.msra.gmra.mxu0 %vm1402_vm1, %v3922_v26 }
 0x3d0   : > { %v1394_v53 = vpop.trf.xlu1 }
 0x3d2   : > { %2983 = vmatmul.msk.f32.gmra.mxu1 %vm1402_vm1, %v1391_v16 }
 0x3d3   : > { %v1740_v26 = vpop.trf.xlu2 }
 0x3d4   : > { %3018 = vmatmul.msk.f32.gmra.mxu3 %vm1402_vm1, %v1740_v26 }
 0x3d7   : > { %v4138_v22 = vpop.f32.mrf.mxu1  ;;  %3027 = vmatmul.msk.f32.gmra.mxu0 %vm1402_vm1, %v3925_v31 }
 0x3d8   : > { %v1395_v16 = vpop.trf.xlu1 }
 0x3da   : > { %2984 = vmatmul.msk.f32.gmra.mxu1 %vm1402_vm1, %v1392_v13 }
 0x3db   : > { %v1741_v31 = vpop.trf.xlu2 }
 0x3dc   : > { %3019 = vmatmul.msk.f32.gmra.mxu3 %vm1402_vm1, %v1741_v31 }
 0x3df   : > { %v4144_v56 = vpop.f32.mrf.mxu1  ;;  %3028 = vmatmul.msk.f32.gmra.mxu0 %vm1402_vm1, %v3928_v33 }
 0x3e0   : > { %v1396_v59 = vpop.trf.xlu1 }
 0x3e2   : > { %2985 = vmatmul.msk.f32.gmra.mxu1 %vm1402_vm1, %v1393_v38 }
 0x3e3   : > { %v1742_v33 = vpop.trf.xlu2 }
 0x3e4   : > { %3020 = vmatmul.msk.f32.gmra.mxu3 %vm1402_vm1, %v1742_v33 }
 0x3e7   : > { %v4150_v10 = vpop.f32.mrf.mxu1  ;;  %3029 = vmatmul.msk.f32.gmra.mxu0 %vm1402_vm1, %v3931_v51 }
 0x3e8   : > { %v1397_v51 = vpop.trf.xlu1 }
 0x3ea   : > { %2986 = vmatmul.msk.f32.gmra.mxu1 %vm1402_vm1, %v1394_v53 }
 0x3eb   : > { %v1743_v3 = vpop.trf.xlu2 }
 0x3ec   : > { %3021 = vmatmul.msk.f32.gmra.mxu3 %vm1402_vm1, %v1743_v3 }
 0x3ef   : > { %v1543_v7 = vpop.f32.mrf.mxu1  ;;  %3030 = vmatmul.msk.f32.gmra.mxu0 %vm1402_vm1, %v3934_v36 }
 0x3f0   : > { %v1398_v13 = vpop.trf.xlu1 }
 0x3f2   : > { %2987 = vmatmul.msk.f32.gmra.mxu1 %vm1402_vm1, %v1395_v16 }
 0x3f3   : > { %v1744_v36 = vpop.trf.xlu2 }
 0x3f4   : > { %3022 = vmatmul.msk.f32.gmra.mxu3 %vm1402_vm1, %v1744_v36 }
 0x3f6   : > { %v4193_v36 = vpop.f32.mrf.mxu3 }
 0x3f7   : > { %v1546_v12 = vpop.f32.mrf.mxu1  ;;  %3031 = vmatmul.msk.f32.gmra.mxu0 %vm1402_vm1, %v3939_v40 }
 0x3f8   : > { %v1399_v38 = vpop.trf.xlu1 }
 0x3fa   : > { %2988 = vmatmul.msk.f32.gmra.mxu1 %vm1402_vm1, %v1396_v59 }
 0x3fb   : > { %v1745_v40 = vpop.trf.xlu2 }
 0x3fc   : > { %3023 = vmatmul.msk.f32.gmra.mxu3 %vm1402_vm1, %v1745_v40  ;;  %v1622_v40 = vmul.f32 %v1546_v12, %v4039_v35  ;;  %v1619_v12 = vmul.f32 %v4144_v56, %v4061_v25 }
 0x3ff   : > { %v1549_v21 = vpop.f32.mrf.mxu1  ;;  %3032 = vmatmul.msk.f32.gmra.mxu0 %vm1402_vm1, %v3944_v1 }
 0x400   : > { %v1400_v53 = vpop.trf.xlu1 }
 0x402   : > { %2989 = vmatmul.msk.f32.gmra.mxu1 %vm1402_vm1, %v1397_v51 }
 0x403   : > { %v1746_v1 = vpop.trf.xlu2 }
 0x404   : > { %3024 = vmatmul.msk.f32.gmra.mxu3 %vm1402_vm1, %v1746_v1 }
 0x407   : > { %v1552_v61 = vpop.f32.mrf.mxu1  ;;  %3033 = vmatmul.msk.f32.gmra.mxu0 %vm1402_vm1, %v3949_v6  ;;  %v4179_v6 = vadd.f32 %v3997_v19, %v1016_v39 }
 0x408   : > { %v1401_v44 = vpop.trf.xlu1  ;;  %v1624_v3 = vmul.f32 %v1552_v61, %v4025_v58  ;;  %v1620_v61 = vmul.f32 %v4150_v10, %v4053_v28  ;;  %v1617_v10 = vmul.f32 %v4132_v9, %v4075_v37  ;;  %v1614_v9 = vmul.f32 %v4077_v2, %v4100_v57  ;;  %v4315_v57 = vld [vmem:[%s4737_s13 + $0xf8] sm:$0xff] }
 0x409   : > { %v1178_v31 = vand.u32 2147483647, %v4179_v6 }
 0x40a   : > { %2990 = vmatmul.msk.f32.gmra.mxu1 %vm1402_vm1, %v1398_v13  ;;  %v1623_v13 = vmul.f32 %v1549_v21, %v4033_v30 }
 0x40b   : > { %v1747_v16 = vpop.trf.xlu2 }
 0x40c   : > { %3025 = vmatmul.msk.f32.gmra.mxu3 %vm1402_vm1, %v1747_v16 }
 0x40f   : > { %v1555_v62 = vpop.f32.mrf.mxu1  ;;  %3034 = vmatmul.msk.f32.gmra.mxu0 %vm1402_vm1, %v3954_v8  ;;  %v1194_v8 = vsub.f32 0.0, %v1178_v31 }
 0x411   : > { %v1210_v51 = vmul.f32 1.442695, %v1194_v8  ;;  %v1162_v8 = vmax.f32 %v4179_v6, 0.0 }
 0x412   : > { %2991 = vmatmul.msk.f32.gmra.mxu1 %vm1402_vm1, %v1399_v38  ;;  %v1621_v38 = vmul.f32 %v1543_v7, %v4045_v32  ;;  %v1618_v7 = vmul.f32 %v4138_v22, %v4068_v55 }
 0x413   : > { %3244 = vpow2.f32 %v1210_v51  ;;  %v2077_v21 = vpop.trf.xlu2 }
 0x417   : > { %v1558_v26 = vpop.f32.mrf.mxu1  ;;  %3035 = vmatmul.msk.f32.gmra.mxu0 %vm1402_vm1, %v3959_v11  ;;  %v1625_v11 = vmul.f32 %v1555_v62, %v4015_v4 }
 0x418   : > { %v1626_v19 = vmul.f32 %v1558_v26, %v4009_v48  ;;  %v1615_v26 = vmul.f32 %v4109_v63, %v4093_v29 }
 0x419   : > { %v3245_v62 = vpop.eup %3244 }
 0x41a   : > { %2992 = vmatmul.msk.f32.gmra.mxu1 %vm1402_vm1, %v1400_v53  ;;  %v1242_v1 = vadd.f32 1.0, %v3245_v62  ;;  %v1616_v53 = vmul.f32 %v4128_v34, %v4084_v24  ;;  %v1613_v34 = vmul.f32 %v4047_v42, %v4107_v15 }
 0x41b   : > { %v2078_v22 = vpop.trf.xlu2 }
 0x41c   : > { %3246 = vlog2.f32 %v1242_v1 }
 0x41f   : > { %v1561_v59 = vpop.f32.mrf.mxu1  ;;  %3036 = vmatmul.msk.f32.gmra.mxu0 %vm1402_vm1, %v3964_v14 }
 0x420   : > { %v1627_v33 = vmul.f32 %v1561_v59, %v4004_v47 }
 0x422   : > { %2993 = vmatmul.msk.f32.gmra.mxu1 %vm1402_vm1, %v1401_v44  ;;  %1644 = vmatpush.msra.mxu2 %v1627_v33  ;;  %v3247_v56 = vpop.eup %3246 }
 0x423   : > { %v1259_v31 = vmul.f32 0.6931472, %v3247_v56  ;;  %v2079_v2 = vpop.trf.xlu2 }
 0x424   : > { %1645 = vmatpush.msra.mxu2 %v1626_v19 }
 0x425   : > { %v1290_v63 = vadd.f32 %v1259_v31, %v1162_v8 }
 0x426   : > { %1646 = vmatpush.msra.mxu2 %v1625_v11 }
 0x427   : > { %v4196_v14 = vpop.f32.mrf.mxu1  ;;  %3037 = vmatmul.msk.f32.gmra.mxu0 %vm1402_vm1, %v3969_v17  ;;  %v4208_v17 = vpop.f32.mrf.mxu3 }
 0x428   : > { %1647 = vmatpush.msra.mxu2 %v1624_v3 }
 0x42a   : > { %1648 = vmatpush.msra.mxu2 %v1623_v13 }
 0x42b   : > { %v2080_v6 = vpop.trf.xlu2 }
 0x42c   : > { %1649 = vmatpush.msra.mxu2 %v1622_v40 }
 0x42e   : > { %1650 = vmatpush.msra.mxu2 %v1621_v38 }
 0x42f   : > { %v4204_v39 = vpop.f32.mrf.mxu1  ;;  %3038 = vmatmul.msk.f32.gmra.mxu0 %vm1402_vm1, %v3974_v60  ;;  %v4224_v16 = vpop.f32.mrf.mxu3 }
 0x430   : > { %1651 = vmatpush.msra.mxu2 %v1620_v61 }
 0x432   : > { %1652 = vmatpush.msra.mxu2 %v1619_v12 }
 0x433   : > { %v2081_v11 = vpop.trf.xlu2 }
 0x434   : > { %1653 = vmatpush.msra.mxu2 %v1618_v7 }
 0x436   : > { %1654 = vmatpush.msra.mxu2 %v1617_v10 }
 0x437   : > { %v4218_v60 = vpop.f32.mrf.mxu1  ;;  %3039 = vmatmul.msk.f32.gmra.mxu0 %vm1402_vm1, %v3979_v20  ;;  %v1612_v20 = vmul.f32 %v4017_v18, %v4116_v41  ;;  %v4237_v44 = vpop.f32.mrf.mxu3 }
 0x438   : > { %1655 = vmatpush.msra.mxu2 %v1616_v53 }
 0x43a   : > { %1656 = vmatpush.msra.mxu2 %v1615_v26 }
 0x43b   : > { %v2082_v38 = vpop.trf.xlu2 }
 0x43c   : > { %1657 = vmatpush.msra.mxu2 %v1614_v9 }
 0x43e   : > { %1658 = vmatpush.msra.mxu2 %v1613_v34 }
 0x43f   : > { %v4233_v59 = vpop.f32.mrf.mxu1  ;;  %3040 = vmatmul.msk.f32.gmra.mxu0 %vm1402_vm1, %v3982_v23  ;;  %v4247_v33 = vpop.f32.mrf.mxu3 }
 0x440   : > { %1659 = vmatpush.msra.mxu2 %v1612_v20 }
 0x441   : > { %1660 = vmatmul.f32.vlgmr.msra.gmra.mxu2 %v1290_v63 }
 0x444   : > { %v4239_v19 = vpop.f32.mrf.mxu0 }
 0x445   : > { %4798 = vst [vmem:[#allocation39_spill] sm:$0xff] %v4239_v19 }
 0x447   : > { %v4241_v42 = vpop.f32.mrf.mxu1  ;;  %3041 = vmatmul.msk.f32.gmra.mxu0 %vm1402_vm1, %v3985_v27  ;;  %v4257_v13 = vpop.f32.mrf.mxu3 }
 0x44c   : > { %v4245_v18 = vpop.f32.mrf.mxu0 }
 0x44d   : > { %4799 = vst [vmem:[#allocation40_spill] sm:$0xff] %v4245_v18 }
 0x44f   : > { %v4249_v51 = vpop.f32.mrf.mxu1  ;;  %3042 = vmatmul.msk.f32.gmra.mxu0 %vm1402_vm1, %v2077_v21  ;;  %v4264_v62 = vpop.f32.mrf.mxu3 }
 0x450   : > { %v2083_v21 = vpop.trf.xlu2 }
 0x454   : > { %v4252_v23 = vpop.f32.mrf.mxu0 }
 0x455   : > { %4800 = vst [vmem:[#allocation41_spill] sm:$0xff] %v4252_v23 }
 0x457   : > { %v4254_v3 = vpop.f32.mrf.mxu1  ;;  %3043 = vmatmul.msk.f32.gmra.mxu0 %vm1402_vm1, %v2078_v22  ;;  %v4271_v12 = vpop.f32.mrf.mxu3 }
 0x458   : > { %v2084_v56 = vpop.trf.xlu2 }
 0x45c   : > { %v4259_v40 = vpop.f32.mrf.mxu0 }
 0x45d   : > { %4801 = vst [vmem:[#allocation42_spill] sm:$0xff] %v4259_v40 }
 0x45f   : > { %v4261_v27 = vpop.f32.mrf.mxu1  ;;  %3044 = vmatmul.msk.f32.gmra.mxu0 %vm1402_vm1, %v2079_v2  ;;  %v4278_v26 = vpop.f32.mrf.mxu3 }
 0x460   : > { %v2085_v31 = vpop.trf.xlu2 }
 0x464   : > { %v4266_v61 = vpop.f32.mrf.mxu0 }
 0x465   : > { %4802 = vst [vmem:[#allocation43_spill] sm:$0xff] %v4266_v61 }
 0x467   : > { %v4268_v1 = vpop.f32.mrf.mxu1  ;;  %3045 = vmatmul.msk.f32.gmra.mxu0 %vm1402_vm1, %v2080_v6  ;;  %v4284_v8 = vpop.f32.mrf.mxu3 }
 0x468   : > { %v2086_v2 = vpop.trf.xlu2 }
 0x46c   : > { %v4273_v7 = vpop.f32.mrf.mxu0 }
 0x46d   : > { %4803 = vst [vmem:[#allocation44_spill] sm:$0xff] %v4273_v7  ;;  %v4330_v7 = vld [vmem:[%s4737_s13 + $0xe0] sm:$0xff] }
 0x46f   : > { %v1591_v10 = vpop.f32.mrf.mxu1  ;;  %3046 = vmatmul.msk.f32.gmra.mxu0 %vm1402_vm1, %v2081_v11  ;;  %v4289_v6 = vpop.f32.mrf.mxu3 }
 0x470   : > { %v2087_v54 = vpop.trf.xlu2 }
 0x474   : > { %v4276_v53 = vpop.f32.mrf.mxu0 }
 0x475   : > { %4804 = vst [vmem:[#allocation45_spill] sm:$0xff] %v4276_v53  ;;  %v4336_v53 = vld [vmem:[%s4737_s13 + $0xd8] sm:$0xff] }
 0x477   : > { %v1594_v22 = vpop.f32.mrf.mxu1  ;;  %3047 = vmatmul.msk.f32.gmra.mxu0 %vm1402_vm1, %v2082_v38  ;;  %v1098_v38 = vadd.f32 %v3868_v45, %v3900_v5  ;;  %v4310_v45 = vld [vmem:[%s4737_s13 + $0xf0] sm:$0xff] }
 0x478   : > { %v2088_v40 = vpop.trf.xlu2 }
 0x479   : > { %v4301_v41 = vadd.f32 %v3864_v43, %v1098_v38 }
 0x47b   : > { %v1179_v23 = vand.u32 2147483647, %v4301_v41  ;;  %v1163_v55 = vmax.f32 %v4301_v41, 0.0 }
 0x47c   : > { %v4281_v9 = vpop.f32.mrf.mxu0 }
 0x47d   : > { %4805 = vst [vmem:[#allocation46_spill] sm:$0xff] %v4281_v9 }
 0x47f   : > { %v1597_v34 = vpop.f32.mrf.mxu1  ;;  %3048 = vmatmul.msk.f32.gmra.mxu0 %vm1402_vm1, %v2083_v21  ;;  %v4296_v21 = vpop.f32.mrf.mxu3 }
 0x484   : > { %v4286_v20 = vpop.f32.mrf.mxu0 }
 0x485   : > { %4806 = vst [vmem:[#allocation47_spill] sm:$0xff] %v4286_v20 }
 0x487   : > { %v1600_v63 = vpop.f32.mrf.mxu1  ;;  %3049 = vmatmul.msk.f32.gmra.mxu0 %vm1402_vm1, %v2084_v56  ;;  %v4317_v43 = vpop.f32.mrf.mxu3 }
 0x48c   : > { %v4291_v11 = vpop.f32.mrf.mxu0 }
 0x48d   : > { %4807 = vst [vmem:[#allocation48_spill] sm:$0xff] %v4291_v11 }
 0x48f   : > { %v1603_v19 = vpop.f32.mrf.mxu1  ;;  %3050 = vmatmul.msk.f32.gmra.mxu0 %vm1402_vm1, %v2085_v31  ;;  %v1195_v31 = vsub.f32 0.0, %v1179_v23 }
 0x491   : > { %v1212_v29 = vmul.f32 1.442695, %v1195_v31  ;;  %v1639_v31 = vmul.f32 %v1597_v34, %v4336_v53  ;;  %v4358_v34 = vld [vmem:[%s4737_s13 + $0xc0] sm:$0xff] }
 0x493   : > { %3248 = vpow2.f32 %v1212_v29 }
 0x494   : > { %v4298_v18 = vpop.f32.mrf.mxu0 }
 0x497   : > { %v1606_v56 = vpop.f32.mrf.mxu1  ;;  %3051 = vmatmul.msk.f32.gmra.mxu0 %vm1402_vm1, %v2086_v2  ;;  %v4322_v2 = vld [vmem:[%s4737_s13 + $0xe8] sm:$0xff] }
 0x498   : > { %v1642_v23 = vmul.f32 %v1606_v56, %v4310_v45  ;;  %v1641_v24 = vmul.f32 %v1603_v19, %v4322_v2  ;;  %v4345_v19 = vld [vmem:[%s4737_s13 + $0xd0] sm:$0xff] }
 0x499   : > { %v1638_v37 = vmul.f32 %v1594_v22, %v4345_v19 }
 0x49c   : > { %v4305_v15 = vpop.f32.mrf.mxu0 }
 0x49f   : > { %v1609_v38 = vpop.f32.mrf.mxu1  ;;  %3052 = vmatmul.msk.f32.gmra.mxu0 %vm1402_vm1, %v2087_v54  ;;  %v1640_v54 = vmul.f32 %v1600_v63, %v4330_v7  ;;  %v4352_v63 = vld [vmem:[%s4737_s13 + $0xc8] sm:$0xff] }
 0x4a0   : > { %v1643_v61 = vmul.f32 %v1609_v38, %v4315_v57  ;;  %v2089_v38 = vpop.trf.xlu2  ;;  %v1637_v29 = vmul.f32 %v1591_v10, %v4352_v63 }
 0x4a2   : > { %1664 = vmatpush.msrb.mxu2 %v1643_v61  ;;  %v1948_v61 = vpop.f32.mrf.mxu3 }
 0x4a3   : > { %v1986_v41 = vmul.f32 %v1948_v61, %v4322_v2  ;;  %v1982_v61 = vmul.f32 %v4284_v8, %v4352_v63 }
 0x4a4   : > { %1665 = vmatpush.msrb.mxu2 %v1642_v23  ;;  %v4339_v56 = vpop.f32.mrf.mxu0 }
 0x4a6   : > { %1666 = vmatpush.msrb.mxu2 %v1641_v24  ;;  %v3249_v24 = vpop.eup %3248 }
 0x4a7   : > { %3053 = vmatmul.msk.f32.gmra.mxu0 %vm1402_vm1, %v2088_v40  ;;  %v1636_v40 = vmul.f32 %v4268_v1, %v4358_v34  ;;  %v1243_v23 = vadd.f32 1.0, %v3249_v24  ;;  %v1101_v1 = vadd.f32 %v3876_v49, %v3900_v5 }
 0x4a8   : > { %1667 = vmatpush.msrb.mxu2 %v1640_v54  ;;  %v4367_v54 = vld [vmem:[%s4737_s13 + $0xb8] sm:$0xff] }
 0x4a9   : > { %v1635_v10 = vmul.f32 %v4261_v27, %v4367_v54  ;;  %3250 = vlog2.f32 %v1243_v23  ;;  %v4384_v27 = vld [vmem:[%s4737_s13 + $0xa8] sm:$0xff]  ;;  %v4396_v23 = vld [vmem:[%s4737_s13 + $0xa0] sm:$0xff] }
 0x4aa   : > { %1668 = vmatpush.msrb.mxu2 %v1639_v31  ;;  %v2090_v31 = vpop.trf.xlu2  ;;  %v1978_v8 = vmul.f32 %v4257_v13, %v4384_v27 }
 0x4ac   : > { %1669 = vmatpush.msrb.mxu2 %v1638_v37  ;;  %v4362_v22 = vpop.f32.mrf.mxu0  ;;  %v4377_v37 = vld [vmem:[%s4737_s13 + $0xb0] sm:$0xff] }
 0x4ad   : > { %v1634_v24 = vmul.f32 %v4254_v3, %v4377_v37  ;;  %v1632_v3 = vmul.f32 %v4241_v42, %v4396_v23 }
 0x4ae   : > { %1670 = vmatpush.msrb.mxu2 %v1637_v29  ;;  %v1951_v29 = vpop.f32.mrf.mxu3 }
 0x4af   : > { %3054 = vmatmul.msk.f32.gmra.mxu0 %vm1402_vm1, %v2089_v38  ;;  %v1633_v38 = vmul.f32 %v4249_v51, %v4384_v27  ;;  %v3251_v51 = vpop.eup %3250 }
 0x4b0   : > { %1671 = vmatpush.msrb.mxu2 %v1636_v40  ;;  %v4391_v40 = vadd.f32 %v3870_v46, %v1101_v1 }
 0x4b2   : > { %1672 = vmatpush.msrb.mxu2 %v1635_v10  ;;  %v4403_v10 = vld [vmem:[%s4737_s13 + $0x98] sm:$0xff]  ;;  %v1181_v1 = vand.u32 2147483647, %v4391_v40 }
 0x4b3   : > { %v1631_v46 = vmul.f32 %v4233_v59, %v4403_v10  ;;  %v1261_v59 = vmul.f32 0.6931472, %v3251_v51 }
 0x4b4   : > { %1673 = vmatpush.msrb.mxu2 %v1634_v24  ;;  %v4388_v49 = vpop.f32.mrf.mxu0  ;;  %v4412_v24 = vld [vmem:[%s4737_s13 + $0x90] sm:$0xff]  ;;  %v1197_v20 = vsub.f32 0.0, %v1181_v1 }
 0x4b5   : > { %v1630_v42 = vmul.f32 %v4218_v60, %v4412_v24  ;;  %v4429_v60 = vld [vmem:[%s4737_s13 + $0x80] sm:$0xff]  ;;  %v1975_v13 = vmul.f32 %v4224_v16, %v4412_v24 }
 0x4b6   : > { %1674 = vmatpush.msrb.mxu2 %v1633_v38  ;;  %v2091_v38 = vpop.trf.xlu2  ;;  %v1954_v5 = vpop.f32.mrf.mxu3  ;;  %v1216_v25 = vmul.f32 1.442695, %v1197_v20 }
 0x4b7   : > { %3055 = vmatmul.msk.f32.gmra.mxu0 %vm1402_vm1, %v2090_v31  ;;  %v4419_v31 = vld [vmem:[%s4737_s13 + $0x88] sm:$0xff]  ;;  %v1988_v51 = vmul.f32 %v1954_v5, %v4315_v57  ;;  %v1983_v5 = vmul.f32 %v4289_v6, %v4345_v19  ;;  %v1022_v6 = vadd.f32 %v3878_v50, %v3897_v0  ;;  %v1976_v50 = vmul.f32 %v4237_v44, %v4403_v10 }
 0x4b8   : > { %1675 = vmatpush.msrb.mxu2 %v1632_v3  ;;  %v1629_v3 = vmul.f32 %v4204_v39, %v4419_v31  ;;  %v1291_v39 = vadd.f32 %v1261_v59, %v1163_v55  ;;  %3252 = vpow2.f32 %v1216_v25  ;;  %v1984_v55 = vmul.f32 %v4296_v21, %v4336_v53 }
 0x4b9   : > { %v1979_v21 = vmul.f32 %v4264_v62, %v4377_v37  ;;  %v1973_v44 = vmul.f32 %v4193_v36, %v4429_v60  ;;  %v2314_v36 = vmul.f32 %v4362_v22, %v4025_v58  ;;  %v4809_v22 = vld [vmem:[#allocation31_spill] sm:$0xff] }
 0x4ba   : > { %1676 = vmatpush.msrb.mxu2 %v1631_v46  ;;  %v1628_v46 = vmul.f32 %v4196_v14, %v4429_v60  ;;  %v1985_v14 = vmul.f32 %v4317_v43, %v4330_v7  ;;  %v1981_v43 = vmul.f32 %v4278_v26, %v4358_v34  ;;  %v4461_v26 = vadd.f32 %v3880_v52, %v1022_v6  ;;  %v4818_v6 = vld [vmem:[#allocation43_spill] sm:$0xff] }
 0x4bb   : > { %v1974_v52 = vmul.f32 %v4208_v17, %v4419_v31  ;;  %v2315_v17 = vmul.f32 %v4388_v49, %v4015_v4  ;;  %v2311_v4 = vmul.f32 %v4298_v18, %v4045_v32 }
 0x4bc   : > { %1677 = vmatpush.msrb.mxu2 %v1630_v42  ;;  %v4423_v9 = vpop.f32.mrf.mxu0  ;;  %v1987_v42 = vmul.f32 %v1951_v29, %v4310_v45  ;;  %v1182_v62 = vand.u32 2147483647, %v4461_v26 }
 0x4be   : > { %1678 = vmatpush.msrb.mxu2 %v1629_v3  ;;  %v2092_v11 = vpop.trf.xlu2  ;;  %v3253_v20 = vpop.eup %3252 }
 0x4bf   : > { %3056 = vmatmul.msk.f32.gmra.mxu0 %vm1402_vm1, %v2091_v38  ;;  %v1245_v29 = vadd.f32 1.0, %v3253_v20  ;;  %v4814_v20 = vld [vmem:[#allocation45_spill] sm:$0xff] }
 0x4c0   : > { %1679 = vmatpush.msrb.mxu2 %v1628_v46 }
 0x4c1   : > { %1680 = vmatmul.f32.vlgmr.msrb.gmra.mxu2 %v1291_v39  ;;  %3254 = vlog2.f32 %v1245_v29  ;;  %v4816_v29 = vld [vmem:[#allocation44_spill] sm:$0xff] }
 0x4c2   : > { %2009 = vmatpush.msra.mxu2 %v1988_v51  ;;  %v1198_v51 = vsub.f32 0.0, %v1182_v62  ;;  %v4821_v62 = vld [vmem:[#allocation37_spill] sm:$0xff] }
 0x4c4   : > { %2010 = vmatpush.msra.mxu2 %v1987_v42  ;;  %v2251_v1 = vpop.f32.mrf.mxu0  ;;  %v1218_v16 = vmul.f32 1.442695, %v1198_v51  ;;  %v4823_v51 = vld [vmem:[#allocation38_spill] sm:$0xff] }
 0x4c5   : > { %v2317_v42 = vmul.f32 %v2251_v1, %v4004_v47  ;;  %v2313_v47 = vmul.f32 %v4339_v56, %v4033_v30  ;;  %v2312_v1 = vmul.f32 %v4305_v15, %v4039_v35  ;;  %v4811_v56 = vld [vmem:[#allocation32_spill] sm:$0xff]  ;;  %v4812_v35 = vld [vmem:[#allocation46_spill] sm:$0xff] }
 0x4c6   : > { %2011 = vmatpush.msra.mxu2 %v1986_v41  ;;  %v2316_v41 = vmul.f32 %v4423_v9, %v4009_v48  ;;  %3256 = vpow2.f32 %v1218_v16  ;;  %v2308_v15 = vmul.f32 %v4812_v35, %v4811_v56  ;;  %v4827_v56 = vld [vmem:[#allocation24_spill] sm:$0xff] }
 0x4c7   : > { %3057 = vmatmul.msk.f32.gmra.mxu0 %vm1402_vm1, %v2092_v11  ;;  %v1980_v11 = vmul.f32 %v4271_v12, %v4367_v54  ;;  %v1977_v12 = vmul.f32 %v4247_v33, %v4396_v23  ;;  %v3255_v59 = vpop.eup %3254  ;;  %v1165_v33 = vmax.f32 %v4391_v40, 0.0 }
 0x4c8   : > { %2012 = vmatpush.msra.mxu2 %v1985_v14  ;;  %v1265_v3 = vmul.f32 0.6931472, %v3255_v59  ;;  %v4808_v14 = vld [vmem:[#allocation48_spill] sm:$0xff] }
 0x4c9   : > { %v2310_v58 = vmul.f32 %v4808_v14, %v4053_v28 }
 0x4ca   : > { %2013 = vmatpush.msra.mxu2 %v1984_v55  ;;  %v1293_v39 = vadd.f32 %v1265_v3, %v1165_v33  ;;  %v4810_v55 = vld [vmem:[#allocation47_spill] sm:$0xff]  ;;  %v1166_v33 = vmax.f32 %v4461_v26, 0.0 }
 0x4cb   : > { %v2309_v30 = vmul.f32 %v4810_v55, %v4809_v22  ;;  %v4825_v22 = vld [vmem:[#allocation30_spill] sm:$0xff]  ;;  %v4826_v55 = vld [vmem:[#allocation25_spill] sm:$0xff] }
 0x4cc   : > { %2014 = vmatpush.msra.mxu2 %v1983_v5  ;;  %v4446_v25 = vpop.f32.mrf.mxu0  ;;  %v3257_v48 = vpop.eup %3256  ;;  %v4813_v5 = vld [vmem:[#allocation33_spill] sm:$0xff] }
 0x4cd   : > { %v1246_v49 = vadd.f32 1.0, %v3257_v48  ;;  %v2307_v32 = vmul.f32 %v4814_v20, %v4813_v5 }
 0x4ce   : > { %2015 = vmatpush.msra.mxu2 %v1982_v61  ;;  %v4815_v61 = vld [vmem:[#allocation34_spill] sm:$0xff] }
 0x4cf   : > { %3258 = vlog2.f32 %v1246_v49 }
 0x4d0   : > { %2016 = vmatpush.msra.mxu2 %v1981_v43  ;;  %v2306_v43 = vmul.f32 %v4816_v29, %v4815_v61 }
 0x4d2   : > { %2017 = vmatpush.msra.mxu2 %v1980_v11  ;;  %v4817_v11 = vld [vmem:[#allocation35_spill] sm:$0xff] }
 0x4d4   : > { %2018 = vmatpush.msra.mxu2 %v1979_v21  ;;  %v4458_v38 = vpop.f32.mrf.mxu0  ;;  %v2305_v21 = vmul.f32 %v4818_v6, %v4817_v11 }
 0x4d5   : > { %v3259_v28 = vpop.eup %3258 }
 0x4d6   : > { %2019 = vmatpush.msra.mxu2 %v1978_v8  ;;  %v4819_v8 = vld [vmem:[#allocation36_spill] sm:$0xff] }
 0x4d8   : > { %2020 = vmatpush.msra.mxu2 %v1977_v12  ;;  %v4820_v12 = vld [vmem:[#allocation42_spill] sm:$0xff] }
 0x4d9   : > { %v2304_v59 = vmul.f32 %v4820_v12, %v4819_v8 }
 0x4da   : > { %2021 = vmatpush.msra.mxu2 %v1976_v50  ;;  %v1267_v50 = vmul.f32 0.6931472, %v3259_v28 }
 0x4dc   : > { %2022 = vmatpush.msra.mxu2 %v1975_v13  ;;  %v4472_v46 = vpop.f32.mrf.mxu0  ;;  %v4822_v13 = vld [vmem:[#allocation41_spill] sm:$0xff] }
 0x4dd   : > { %v2303_v3 = vmul.f32 %v4822_v13, %v4821_v62 }
 0x4de   : > { %2023 = vmatpush.msra.mxu2 %v1974_v52 }
 0x4e0   : > { %2024 = vmatpush.msra.mxu2 %v1973_v44  ;;  %v4824_v44 = vld [vmem:[#allocation40_spill] sm:$0xff] }
 0x4e1   : > { %2025 = vmatmul.f32.vlgmr.msra.gmra.mxu2 %v1293_v39  ;;  %v2302_v39 = vmul.f32 %v4824_v44, %v4823_v51 }
 0x4e2   : > { %2334 = vmatpush.msrb.mxu2 %v2317_v42  ;;  %v1294_v42 = vadd.f32 %v1267_v50, %v1166_v33 }
 0x4e4   : > { %2335 = vmatpush.msrb.mxu2 %v2316_v41  ;;  %v4482_v40 = vpop.f32.mrf.mxu0 }
 0x4e6   : > { %2336 = vmatpush.msrb.mxu2 %v2315_v17 }
 0x4e8   : > { %2337 = vmatpush.msrb.mxu2 %v2314_v36  ;;  %v2390_v36 = vpop.trf.xlu0 }
 0x4e9   : > { %3058 = vmatmul.msk.f32.vlgmr.msra.gmra.mxu1 %vm1402_vm1, %v2390_v36 }
 0x4ea   : > { %2338 = vmatpush.msrb.mxu2 %v2313_v47 }
 0x4ec   : > { %2339 = vmatpush.msrb.mxu2 %v2312_v1  ;;  %v4492_v9 = vpop.f32.mrf.mxu0 }
 0x4ed   : > { %v2322_v44 = vmul.f32 %v4492_v9, %v4396_v23  ;;  %v2318_v9 = vmul.f32 %v4446_v25, %v4429_v60  ;;  %v2422_v25 = vpop.trf.xlu1 }
 0x4ee   : > { %2340 = vmatpush.msrb.mxu2 %v2311_v4 }
 0x4f0   : > { %2341 = vmatpush.msrb.mxu2 %v2310_v58  ;;  %v2391_v1 = vpop.trf.xlu0 }
 0x4f1   : > { %3059 = vmatmul.msk.f32.gmra.mxu1 %vm1402_vm1, %v2391_v1 }
 0x4f2   : > { %2342 = vmatpush.msrb.mxu2 %v2309_v30  ;;  %v1104_v30 = vadd.f32 %v4826_v55, %v4825_v22 }
 0x4f4   : > { %2343 = vmatpush.msrb.mxu2 %v2308_v15  ;;  %v4502_v18 = vpop.f32.mrf.mxu0  ;;  %v1145_v35 = vadd.f32 %v4827_v56, %v1104_v30 }
 0x4f5   : > { %v2323_v51 = vmul.f32 %v4502_v18, %v4384_v27 }
 0x4f6   : > { %2344 = vmatpush.msrb.mxu2 %v2307_v32  ;;  %v1183_v20 = vand.u32 2147483647, %v1145_v35  ;;  %v1167_v18 = vmax.f32 %v1145_v35, 0.0  ;;  %v4560_v35 = vpop.f32.mrf.mxu2 }
 0x4f8   : > { %2345 = vmatpush.msrb.mxu2 %v2306_v43  ;;  %v2392_v4 = vpop.trf.xlu0  ;;  %v1199_v32 = vsub.f32 0.0, %v1183_v20 }
 0x4f9   : > { %3060 = vmatmul.msk.f32.gmra.mxu1 %vm1402_vm1, %v2392_v4 }
 0x4fa   : > { %2346 = vmatpush.msrb.mxu2 %v2305_v21  ;;  %v1220_v28 = vmul.f32 1.442695, %v1199_v32 }
 0x4fc   : > { %2347 = vmatpush.msrb.mxu2 %v2304_v59  ;;  %v2272_v52 = vpop.f32.mrf.mxu0  ;;  %3260 = vpow2.f32 %v1220_v28 }
 0x4fd   : > { %v2324_v33 = vmul.f32 %v2272_v52, %v4377_v37 }
 0x4fe   : > { %2348 = vmatpush.msrb.mxu2 %v2303_v3 }
 0x500   : > { %2349 = vmatpush.msrb.mxu2 %v2302_v39  ;;  %v2393_v49 = vpop.trf.xlu0 }
 0x501   : > { %2350 = vmatmul.f32.vlgmr.msrb.gmra.mxu2 %v1294_v42  ;;  %3061 = vmatmul.msk.f32.gmra.mxu1 %vm1402_vm1, %v2393_v49 }
 0x502   : > { %v3261_v59 = vpop.eup %3260 }
 0x503   : > { %v1247_v62 = vadd.f32 1.0, %v3261_v59 }
 0x504   : > { %v2275_v16 = vpop.f32.mrf.mxu0 }
 0x505   : > { %v2325_v3 = vmul.f32 %v2275_v16, %v4367_v54  ;;  %3262 = vlog2.f32 %v1247_v62  ;;  %v2320_v16 = vmul.f32 %v4472_v46, %v4412_v24 }
 0x508   : > { %v2394_v58 = vpop.trf.xlu0 }
 0x509   : > { %3062 = vmatmul.msk.f32.gmra.mxu1 %vm1402_vm1, %v2394_v58 }
 0x50b   : > { %v3263_v42 = vpop.eup %3262 }
 0x50c   : > { %v2278_v41 = vpop.f32.mrf.mxu0  ;;  %v1269_v52 = vmul.f32 0.6931472, %v3263_v42 }
 0x50d   : > { %v2326_v13 = vmul.f32 %v2278_v41, %v4358_v34  ;;  %v2321_v41 = vmul.f32 %v4482_v40, %v4403_v10  ;;  %v4828_v40 = vld [vmem:[#allocation23_spill] sm:$0xff] }
 0x50e   : > { %v1295_v36 = vadd.f32 %v1269_v52, %v1167_v18  ;;  %v4830_v18 = vld [vmem:[#allocation27_spill] sm:$0xff] }
 0x510   : > { %v2395_v5 = vpop.trf.xlu0 }
 0x511   : > { %3063 = vmatmul.msk.f32.gmra.mxu1 %vm1402_vm1, %v2395_v5 }
 0x514   : > { %v2281_v17 = vpop.f32.mrf.mxu0 }
 0x515   : > { %v2327_v50 = vmul.f32 %v2281_v17, %v4352_v63  ;;  %v2319_v17 = vmul.f32 %v4458_v38, %v4419_v31 }
 0x518   : > { %v2396_v43 = vpop.trf.xlu0 }
 0x519   : > { %3064 = vmatmul.msk.f32.gmra.mxu1 %vm1402_vm1, %v2396_v43 }
 0x51c   : > { %v2284_v47 = vpop.f32.mrf.mxu0 }
 0x51d   : > { %v2328_v12 = vmul.f32 %v2284_v47, %v4345_v19 }
 0x520   : > { %v2397_v39 = vpop.trf.xlu0 }
 0x524   : > { %v2287_v48 = vpop.f32.mrf.mxu0 }
 0x525   : > { %v2329_v8 = vmul.f32 %v2287_v48, %v4336_v53 }
 0x528   : > { %v2398_v47 = vpop.trf.xlu0 }
 0x52c   : > { %v2290_v26 = vpop.f32.mrf.mxu0 }
 0x52d   : > { %v2330_v21 = vmul.f32 %v2290_v26, %v4330_v7  ;;  %v2423_v26 = vpop.trf.xlu1 }
 0x530   : > { %v2399_v46 = vpop.trf.xlu0 }
 0x534   : > { %v2293_v14 = vpop.f32.mrf.mxu0 }
 0x535   : > { %v2331_v6 = vmul.f32 %v2293_v14, %v4322_v2  ;;  %v2424_v14 = vpop.trf.xlu1 }
 0x538   : > { %v2400_v1 = vpop.trf.xlu0 }
 0x53c   : > { %v2296_v15 = vpop.f32.mrf.mxu0 }
 0x53d   : > { %v2332_v11 = vmul.f32 %v2296_v15, %v4310_v45  ;;  %v2425_v55 = vpop.trf.xlu1 }
 0x540   : > { %v2401_v38 = vpop.trf.xlu0 }
 0x544   : > { %v2299_v61 = vpop.f32.mrf.mxu0  ;;  %v4563_v15 = vpop.f32.mrf.mxu2 }
 0x545   : > { %v2333_v29 = vmul.f32 %v2299_v61, %v4315_v57  ;;  %v2426_v30 = vpop.trf.xlu1 }
 0x547   : > { %2354 = vmatpush.msra.mxu2 %v2333_v29 }
 0x548   : > { %v2402_v48 = vpop.trf.xlu0 }
 0x549   : > { %2355 = vmatpush.msra.mxu2 %v2332_v11 }
 0x54b   : > { %2356 = vmatpush.msra.mxu2 %v2331_v6 }
 0x54d   : > { %2357 = vmatpush.msra.mxu2 %v2330_v21  ;;  %v2427_v56 = vpop.trf.xlu1 }
 0x54f   : > { %2358 = vmatpush.msra.mxu2 %v2329_v8 }
 0x550   : > { %v2403_v4 = vpop.trf.xlu0 }
 0x551   : > { %2359 = vmatpush.msra.mxu2 %v2328_v12 }
 0x553   : > { %2360 = vmatpush.msra.mxu2 %v2327_v50 }
 0x555   : > { %2361 = vmatpush.msra.mxu2 %v2326_v13  ;;  %v2428_v5 = vpop.trf.xlu1 }
 0x557   : > { %2362 = vmatpush.msra.mxu2 %v2325_v3 }
 0x558   : > { %v2404_v49 = vpop.trf.xlu0 }
 0x559   : > { %2363 = vmatpush.msra.mxu2 %v2324_v33 }
 0x55b   : > { %2364 = vmatpush.msra.mxu2 %v2323_v51 }
 0x55d   : > { %2365 = vmatpush.msra.mxu2 %v2322_v44  ;;  %v2429_v32 = vpop.trf.xlu1 }
 0x55f   : > { %2366 = vmatpush.msra.mxu2 %v2321_v41 }
 0x560   : > { %v2405_v58 = vpop.trf.xlu0 }
 0x561   : > { %2367 = vmatpush.msra.mxu2 %v2320_v16  ;;  %v4829_v16 = vld [vmem:[#allocation26_spill] sm:$0xff] }
 0x562   : > { %v1025_v52 = vadd.f32 %v4829_v16, %v3897_v0 }
 0x563   : > { %2368 = vmatpush.msra.mxu2 %v2319_v17 }
 0x564   : > { %v4566_v20 = vpop.f32.mrf.mxu2 }
 0x565   : > { %2369 = vmatpush.msra.mxu2 %v2318_v9  ;;  %v2430_v29 = vpop.trf.xlu1  ;;  %v4591_v9 = vadd.f32 %v4830_v18, %v1025_v52  ;;  %v3283_v52 = vld [vmem:[%s4737_s13 + $0x20] sm:$0xff] }
 0x566   : > { %2370 = vmatmul.f32.vlgmr.msra.gmra.mxu2 %v1295_v36  ;;  %v4577_v50 = vpop.f32.mrf.mxu1 }
 0x567   : > { %3116 = vmatpush.msrb.mxu2 %v4828_v40 }
 0x56d   : > { %v2431_v11 = vpop.trf.xlu1 }
 0x56e   : > { %3065 = vmatmul.msk.f32.vlgmr.msrb.gmra.mxu2 %vm1402_vm1, %v2397_v39  ;;  %v4581_v3 = vpop.f32.mrf.mxu1 }
 0x575   : > { %v2432_v8 = vpop.trf.xlu1 }
 0x576   : > { %3066 = vmatmul.msk.f32.gmra.mxu2 %vm1402_vm1, %v2398_v47  ;;  %v4584_v44 = vpop.f32.mrf.mxu1  ;;  %v1184_v47 = vand.u32 2147483647, %v4591_v9 }
 0x57d   : > { %v2433_v59 = vpop.trf.xlu1 }
 0x57e   : > { %3067 = vmatmul.msk.f32.gmra.mxu2 %vm1402_vm1, %v2399_v46  ;;  %v2560_v17 = vpop.f32.mrf.mxu1 }
 0x584   : > { %v2351_v61 = vpop.f32.mrf.mxu2 }
 0x585   : > { %v2434_v13 = vpop.trf.xlu1 }
 0x586   : > { %3068 = vmatmul.msk.f32.gmra.mxu2 %vm1402_vm1, %v2400_v1  ;;  %v2563_v46 = vpop.f32.mrf.mxu1  ;;  %v1200_v1 = vsub.f32 0.0, %v1184_v47  ;;  %v3284_v47 = vld [vmem:[%s4737_s13 + $0x18] sm:$0xff] }
 0x587   : > { %v2651_v18 = vmul.f32 %v3283_v52, %v2563_v46  ;;  %v3286_v46 = vld [vmem:[%s4737_s13 + $0x8] sm:$0xff] }
 0x58d   : > { %v2435_v51 = vpop.trf.xlu1 }
 0x58e   : > { %3069 = vmatmul.msk.f32.gmra.mxu2 %vm1402_vm1, %v2401_v38 }
 0x595   : > { %v2436_v41 = vpop.trf.xlu1 }
 0x596   : > { %3070 = vmatmul.msk.f32.gmra.mxu2 %vm1402_vm1, %v2402_v48  ;;  %v3272_v48 = vld [vmem:[%s4737_s13 + $0x78] sm:$0xff] }
 0x59d   : > { %v2437_v40 = vpop.trf.xlu1 }
 0x59e   : > { %3071 = vmatmul.msk.f32.gmra.mxu2 %vm1402_vm1, %v2403_v4  ;;  %v3273_v4 = vld [vmem:[%s4737_s13 + $0x70] sm:$0xff] }
 0x5a6   : > { %3072 = vmatmul.msk.f32.gmra.mxu2 %vm1402_vm1, %v2404_v49  ;;  %v3274_v49 = vld [vmem:[%s4737_s13 + $0x68] sm:$0xff] }
 0x5ae   : > { %3073 = vmatmul.msk.f32.gmra.mxu2 %vm1402_vm1, %v2405_v58  ;;  %v2566_v58 = vpop.f32.mrf.mxu1 }
 0x5b6   : > { %3074 = vmatmul.msk.f32.gmra.mxu2 %vm1402_vm1, %v2422_v25  ;;  %v1222_v25 = vmul.f32 1.442695, %v1200_v1  ;;  %v3285_v1 = vld [vmem:[%s4737_s13 + $0x10] sm:$0xff] }
 0x5b8   : > { %3264 = vpow2.f32 %v1222_v25  ;;  %v1168_v25 = vmax.f32 %v4591_v9, 0.0  ;;  %v1682_v9 = vadd.f32 %v4563_v15, %v4560_v35 }
 0x5be   : > { %3075 = vmatmul.msk.f32.gmra.mxu2 %vm1402_vm1, %v2423_v26 }
 0x5c6   : > { %3076 = vmatmul.msk.f32.gmra.mxu2 %vm1402_vm1, %v2424_v14 }
 0x5ce   : > { %3077 = vmatmul.msk.f32.gmra.mxu2 %vm1402_vm1, %v2425_v55  ;;  %v3275_v55 = vld [vmem:[%s4737_s13 + $0x60] sm:$0xff] }
 0x5d6   : > { %3078 = vmatmul.msk.f32.gmra.mxu2 %vm1402_vm1, %v2426_v30 }
 0x5de   : > { %3079 = vmatmul.msk.f32.gmra.mxu2 %vm1402_vm1, %v2427_v56 }
 0x5e6   : > { %3080 = vmatmul.msk.f32.gmra.mxu2 %vm1402_vm1, %v2428_v5  ;;  %v3276_v5 = vld [vmem:[%s4737_s13 + $0x58] sm:$0xff] }
 0x5e9   : > { %v2371_v43 = vpop.f32.mrf.mxu2 }
 0x5ea   : > { %v4570_v28 = vadd.f32 %v2371_v43, %v2351_v61  ;;  %v3277_v61 = vld [vmem:[%s4737_s13 + $0x50] sm:$0xff]  ;;  %v3265_v43 = vpop.eup %3264 }
 0x5ee   : > { %3081 = vmatmul.msk.f32.gmra.mxu2 %vm1402_vm1, %v2429_v32 }
 0x5f1   : > { %v4573_v6 = vpop.f32.mrf.mxu2 }
 0x5f6   : > { %3082 = vmatmul.msk.f32.gmra.mxu2 %vm1402_vm1, %v2430_v29 }
 0x5f9   : > { %v2575_v21 = vpop.f32.mrf.mxu2 }
 0x5fe   : > { %3083 = vmatmul.msk.f32.gmra.mxu2 %vm1402_vm1, %v2431_v11  ;;  %v3278_v11 = vld [vmem:[%s4737_s13 + $0x48] sm:$0xff] }
 0x601   : > { %v2578_v12 = vpop.f32.mrf.mxu2 }
 0x606   : > { %3084 = vmatmul.msk.f32.gmra.mxu2 %vm1402_vm1, %v2432_v8  ;;  %v2656_v8 = vmul.f32 %v3278_v11, %v2578_v12  ;;  %v3281_v12 = vld [vmem:[%s4737_s13 + $0x30] sm:$0xff] }
 0x609   : > { %v2581_v62 = vpop.f32.mrf.mxu2 }
 0x60a   : > { %v2657_v29 = vmul.f32 %v3277_v61, %v2581_v62  ;;  %v3280_v62 = vld [vmem:[%s4737_s13 + $0x38] sm:$0xff] }
 0x60e   : > { %3085 = vmatmul.msk.f32.gmra.mxu2 %vm1402_vm1, %v2433_v59  ;;  %v1248_v59 = vadd.f32 1.0, %v3265_v43 }
 0x610   : > { %3266 = vlog2.f32 %v1248_v59  ;;  %v4832_v59 = vld [vmem:[#allocation29_spill] sm:$0xff] }
 0x611   : > { %v2584_v33 = vpop.f32.mrf.mxu2 }
 0x612   : > { %v2658_v32 = vmul.f32 %v3276_v5, %v2584_v33 }
 0x616   : > { %3086 = vmatmul.msk.f32.gmra.mxu2 %vm1402_vm1, %v2434_v13  ;;  %v3279_v13 = vld [vmem:[%s4737_s13 + $0x40] sm:$0xff] }
 0x617   : > { %v2655_v33 = vmul.f32 %v3279_v13, %v2575_v21  ;;  %v3282_v21 = vld [vmem:[%s4737_s13 + $0x28] sm:$0xff]  ;;  %v1107_v13 = vadd.f32 %v4832_v59, %v4825_v22 }
 0x618   : > { %v2652_v16 = vmul.f32 %v3282_v21, %v2566_v58  ;;  %v2720_v58 = vld [vmem:[#allocation8 + $0x8] sm:$0xff] }
 0x619   : > { %v2587_v39 = vpop.f32.mrf.mxu2 }
 0x61a   : > { %v2659_v30 = vmul.f32 %v3275_v55, %v2587_v39 }
 0x61e   : > { %3087 = vmatmul.msk.f32.gmra.mxu2 %vm1402_vm1, %v2435_v51  ;;  %v2569_v51 = vpop.f32.mrf.mxu1 }
 0x621   : > { %v2590_v42 = vpop.f32.mrf.mxu2 }
 0x622   : > { %v2660_v14 = vmul.f32 %v3274_v49, %v2590_v42  ;;  %v2654_v42 = vmul.f32 %v3280_v62, %v4573_v6  ;;  %v2722_v49 = vld [vmem:[#allocation8 + $0x18] sm:$0xff] }
 0x626   : > { %3088 = vmatmul.msk.f32.gmra.mxu2 %vm1402_vm1, %v2436_v41  ;;  %v2653_v41 = vmul.f32 %v3281_v12, %v2569_v51 }
 0x629   : > { %v2593_v36 = vpop.f32.mrf.mxu2 }
 0x62a   : > { %v2661_v26 = vmul.f32 %v3273_v4, %v2593_v36  ;;  %v3267_v36 = vpop.eup %3266 }
 0x62e   : > { %3089 = vmatmul.msk.f32.gmra.mxu2 %vm1402_vm1, %v2437_v40  ;;  %v2650_v40 = vmul.f32 %v3284_v47, %v2560_v17  ;;  %v3287_v17 = vld [vmem:[%s4737_s13] sm:$0xff] }
 0x62f   : > { %v2647_v4 = vmul.f32 %v3287_v17, %v4577_v50  ;;  %v4831_v50 = vld [vmem:[#allocation39_spill] sm:$0xff] }
 0x631   : > { %v2596_v38 = vpop.f32.mrf.mxu2 }
 0x632   : > { %v2662_v0 = vmul.f32 %v3272_v48, %v2596_v38  ;;  %v2649_v38 = vmul.f32 %v3285_v1, %v4584_v44  ;;  %v1271_v48 = vmul.f32 0.6931472, %v3267_v36 }
 0x634   : > { %2679 = vmatpush.msrb.mxu3 %v2662_v0  ;;  %v2648_v0 = vmul.f32 %v3286_v46, %v4581_v3  ;;  %v2719_v3 = vld [vmem:[#allocation8] sm:$0xff] }
 0x636   : > { %2680 = vmatpush.msrb.mxu3 %v2661_v26  ;;  %v1296_v26 = vadd.f32 %v1271_v48, %v1168_v25 }
 0x638   : > { %2681 = vmatpush.msrb.mxu3 %v2660_v14  ;;  %v2721_v14 = vld [vmem:[#allocation8 + $0x10] sm:$0xff] }
 0x639   : > { %v4607_v56 = vpop.f32.mrf.mxu2 }
 0x63a   : > { %2682 = vmatpush.msrb.mxu3 %v2659_v30  ;;  %v2027_v30 = vadd.f32 %v4566_v20, %v4831_v50 }
 0x63c   : > { %2683 = vmatpush.msrb.mxu3 %v2658_v32 }
 0x63e   : > { %2684 = vmatpush.msrb.mxu3 %v2657_v29 }
 0x640   : > { %2685 = vmatpush.msrb.mxu3 %v2656_v8 }
 0x641   : > { %v4621_v39 = vpop.f32.mrf.mxu2 }
 0x642   : > { %2686 = vmatpush.msrb.mxu3 %v2655_v33  ;;  %v4833_v33 = vld [vmem:[#allocation28_spill] sm:$0xff] }
 0x643   : > { %v1148_v51 = vadd.f32 %v4833_v33, %v1107_v13 }
 0x644   : > { %2687 = vmatpush.msrb.mxu3 %v2654_v42 }
 0x645   : > { %v1185_v62 = vand.u32 2147483647, %v1148_v51  ;;  %v1169_v1 = vmax.f32 %v1148_v51, 0.0 }
 0x646   : > { %2688 = vmatpush.msrb.mxu3 %v2653_v41 }
 0x647   : > { %v1201_v42 = vsub.f32 0.0, %v1185_v62 }
 0x648   : > { %2689 = vmatpush.msrb.mxu3 %v2652_v16 }
 0x649   : > { %v4636_v6 = vpop.f32.mrf.mxu2  ;;  %v1224_v21 = vmul.f32 1.442695, %v1201_v42 }
 0x64a   : > { %2690 = vmatpush.msrb.mxu3 %v2651_v18 }
 0x64b   : > { %3268 = vpow2.f32 %v1224_v21 }
 0x64c   : > { %2691 = vmatpush.msrb.mxu3 %v2650_v40 }
 0x64e   : > { %2692 = vmatpush.msrb.mxu3 %v2649_v38 }
 0x650   : > { %2693 = vmatpush.msrb.mxu3 %v2648_v0 }
 0x651   : > { %v2608_v44 = vpop.f32.mrf.mxu2  ;;  %v3269_v36 = vpop.eup %3268 }
 0x652   : > { %2694 = vmatpush.msrb.mxu3 %v2647_v4  ;;  %v1249_v47 = vadd.f32 1.0, %v3269_v36  ;;  %v2666_v40 = vmul.f32 %v2608_v44, %v4403_v10  ;;  %v3207_v10 = vld [vmem:[%s4835_s28] ss:$0 sm:$0xff] }
 0x653   : > { %2695 = vmatmul.f32.vlgmr.msrb.gmra.mxu3 %v1296_v26 }
 0x654   : > { %2751 = vmatpush.msra.mxu3 %v2722_v49  ;;  %3270 = vlog2.f32 %v1249_v47 }
 0x656   : > { %2752 = vmatpush.msra.mxu3 %v2721_v14 }
 0x658   : > { %2753 = vmatpush.msra.mxu3 %v2720_v58 }
 0x659   : > { %v2611_v55 = vpop.f32.mrf.mxu2 }
 0x65a   : > { %2754 = vmatpush.msra.mxu3 %v2719_v3 }
 0x65b   : > { %3090 = vmatmul.msk.f32.vlgmr.msra.gmra.mxu3 %vm652_vm0, %v1682_v9 }
 0x661   : > { %v2614_v5 = vpop.f32.mrf.mxu2 }
 0x663   : > { %3091 = vmatmul.msk.f32.gmra.mxu3 %vm652_vm0, %v2027_v30 }
 0x669   : > { %v2617_v32 = vpop.f32.mrf.mxu2 }
 0x66b   : > { %3092 = vmatmul.msk.f32.gmra.mxu3 %vm652_vm0, %v4570_v28 }
 0x671   : > { %v2620_v61 = vpop.f32.mrf.mxu2 }
 0x679   : > { %v2623_v29 = vpop.f32.mrf.mxu2 }
 0x681   : > { %v2626_v43 = vpop.f32.mrf.mxu2 }
 0x689   : > { %v2629_v11 = vpop.f32.mrf.mxu2 }
 0x68a   : > { %v2673_v18 = vmul.f32 %v2629_v11, %v4345_v19  ;;  %v2667_v19 = vmul.f32 %v2611_v55, %v4396_v23 }
 0x691   : > { %v2632_v8 = vpop.f32.mrf.mxu2 }
 0x692   : > { %v2674_v22 = vmul.f32 %v2632_v8, %v4336_v53  ;;  %v2668_v53 = vmul.f32 %v2614_v5, %v4384_v27  ;;  %v2663_v27 = vmul.f32 %v4607_v56, %v4429_v60 }
 0x699   : > { %v2635_v35 = vpop.f32.mrf.mxu2 }
 0x69a   : > { %v2675_v52 = vmul.f32 %v2635_v35, %v4330_v7  ;;  %v2669_v7 = vmul.f32 %v2617_v32, %v4377_v37  ;;  %v2664_v37 = vmul.f32 %v4621_v39, %v4419_v31 }
 0x6a1   : > { %v2638_v15 = vpop.f32.mrf.mxu2 }
 0x6a2   : > { %v2676_v16 = vmul.f32 %v2638_v15, %v4322_v2  ;;  %v2670_v2 = vmul.f32 %v2620_v61, %v4367_v54 }
 0x6a9   : > { %v2641_v20 = vpop.f32.mrf.mxu2 }
 0x6aa   : > { %v2677_v28 = vmul.f32 %v2641_v20, %v4310_v45  ;;  %v2671_v45 = vmul.f32 %v2623_v29, %v4358_v34  ;;  %v2665_v34 = vmul.f32 %v4636_v6, %v4412_v24 }
 0x6b1   : > { %v2644_v12 = vpop.f32.mrf.mxu2 }
 0x6b2   : > { %v2678_v41 = vmul.f32 %v2644_v12, %v4315_v57  ;;  %v2672_v57 = vmul.f32 %v2626_v43, %v4352_v63  ;;  %v3271_v63 = vpop.eup %3270 }
 0x6b3   : > { %v1273_v54 = vmul.f32 0.6931472, %v3271_v63 }
 0x6b4   : > { %2699 = vmatpush.msrb.mxu1 %v2678_v41 }
 0x6b5   : > { %v1297_v23 = vadd.f32 %v1273_v54, %v1169_v1 }
 0x6b6   : > { %2700 = vmatpush.msrb.mxu1 %v2677_v28 }
 0x6b8   : > { %2701 = vmatpush.msrb.mxu1 %v2676_v16 }
 0x6ba   : > { %2702 = vmatpush.msrb.mxu1 %v2675_v52 }
 0x6bc   : > { %2703 = vmatpush.msrb.mxu1 %v2674_v22 }
 0x6be   : > { %2704 = vmatpush.msrb.mxu1 %v2673_v18 }
 0x6c0   : > { %2705 = vmatpush.msrb.mxu1 %v2672_v57 }
 0x6c2   : > { %2706 = vmatpush.msrb.mxu1 %v2671_v45 }
 0x6c4   : > { %2707 = vmatpush.msrb.mxu1 %v2670_v2 }
 0x6c6   : > { %2708 = vmatpush.msrb.mxu1 %v2669_v7 }
 0x6c8   : > { %2709 = vmatpush.msrb.mxu1 %v2668_v53 }
 0x6ca   : > { %2710 = vmatpush.msrb.mxu1 %v2667_v19 }
 0x6cc   : > { %2711 = vmatpush.msrb.mxu1 %v2666_v40 }
 0x6ce   : > { %2712 = vmatpush.msrb.mxu1 %v2665_v34 }
 0x6d0   : > { %2713 = vmatpush.msrb.mxu1 %v2664_v37 }
 0x6d2   : > { %2714 = vmatpush.msrb.mxu1 %v2663_v27 }
 0x6d3   : > { %2715 = vmatmul.f32.vlgmr.msrb.gmra.mxu1 %v1297_v23 }
 0x6d6   : > { %v2696_v38 = vpop.f32.mrf.mxu3 }
 0x6de   : > { %v2756_v24 = vpop.f32.mrf.mxu3 }
 0x6df   : > { %v2757_v6 = vadd.f32 %v3207_v10, %v2756_v24 }
 0x6e1   : > { %2768 = vst.msk [vmem:[%s612_s15] sm:$0xff] %vm652_vm0, %v2757_v6 }
 0x6e6   : > { %v2759_v31 = vpop.f32.mrf.mxu3 }
 0x6e7   : > { %v2760_v39 = vadd.f32 %v3207_v10, %v2759_v31 }
 0x6e9   : > { %2769 = vst.msk [vmem:[%s612_s15 + $0x8] sm:$0xff] %vm652_vm0, %v2760_v39 }
 0x6ee   : > { %v2762_v60 = vpop.f32.mrf.mxu3 }
 0x6ef   : > { %v2763_v56 = vadd.f32 %v3207_v10, %v2762_v60 }
 0x6f1   : > { %2770 = vst.msk [vmem:[%s612_s15 + $0x10] sm:$0xff] %vm652_vm0, %v2763_v56 }
 0x750   : > { %v2716_v48 = vpop.f32.mrf.mxu1 }
 0x751   : > { %v2717_v46 = vadd.f32 %v2716_v48, %v2696_v38 }
 0x753   : > { %3093 = vmatmul.msk.f32.gmra.mxu3 %vm652_vm0, %v2717_v46 }
 0x7d6   : > { %v2765_v0 = vpop.f32.mrf.mxu3 }
 0x7d7   : > { %v2766_v25 = vadd.f32 %v3207_v10, %v2765_v0 }
 0x7d9   : > { %2771 = vst.msk [vmem:[%s612_s15 + $0x18] sm:$0xff] %vm652_vm0, %v2766_v25 }
 0x7da   : > { %3435 = shalt.err (!%p3432_p8)
}
 0x7db   : > { %s3492_s17 = smov 128   ;;  %s3493_s15 = smov 8  }
 0x7dc   : > { %3133 = dma.vmem_to_hbm [thread:$0]  (%p3617_p5), %s2786_s22, 512, %s2788_s24, %s2773_s0, %s3492_s17, %s3492_s17, %s3493_s15  }
 0x7dd PF: > { %s4839_s27 = sld [smem:[#allocation18_spill]] }
 0x7de   : > { %s4840_s26 = sld [smem:[#allocation15_spill]] }
 0x7e3   : > { %p3160_p9 = scmp.ge.s32.totalorder %s4839_s27, 2 }
 0x7e4   : > { %s2802_s21 = sand.u32 1, %s4840_s26  }
 0x7e5   : > { %p3149_p10 = pnand %p3160_p9, %p3621_p6  ;;  %s2803_s16 = scalar_lea.sflag [#allocation4], %s2802_s21 }
 0x7e7   : > { %p3150_p11 = pneg %p3149_p10 }
 0x7e9   : > { %3465 = dma.done.wait (%p3150_p11), %s2803_s16, 512  }
 0x7ea   : > { %3467 = vsyncadd (%p3150_p11), %s2803_s16, 4294966784  ;;  %s4842_s24 = sld [smem:[#allocation19_spill]] }
 0x7eb   : > { %s4843_s21 = sld [smem:[#allocation16_spill]] }
 0x7ec   : > { %s4844_s22 = sld [smem:[#allocation17_spill]] }
 0x7ed   : > { %s4845_s23 = sld [smem:[#allocation20_spill]] }
 0x7f0   : > { %p29_p12 = scmp.ge.s32.totalorder %s4842_s24, 4  }
 0x7f2   :  { %31 = sbr.rel (!%p29_p12) target bundleno = 12 (0xc), region = 142 }
 0x7f7   :  { %2809 = vsyncpa [#allocation3], 1 }
 0x7f8   :  { %2811 = vsyncpa [#allocation3 + $0x1], 1 }
 0x7f9   :  { %2812 = vsyncpa [#allocation6], 1 }
 0x7fa   :  { %2813 = vsyncpa [#allocation9], 1 }
 0x7fb   :  { %2814 = vsyncpa [#allocation4], 1 }
 0x7fc   :  { %2816 = vsyncpa [#allocation4 + $0x1], 1 }

</bundles_post_ra>
